<compile_context>
chip_gen: v7x
topology: tpu7x:2x2x1
jax: 0.10.0
libtpu: 0.0.40
codegen_flags: <defaults>
</compile_context>

<pallas_src>
import math

import jax
import jax.numpy as jnp
from jax import lax
from jax.experimental import pallas as pl
from jax.experimental.pallas import tpu as pltpu

EPS_LN = 1e-5   # PyTorch nn.LayerNorm default
EPS_BN = 1e-5   # PyTorch nn.BatchNorm1d default
NEG_INF = -1e30


def _layernorm(x, gamma, beta):
    mu = jnp.mean(x, axis=-1, keepdims=True)
    var = jnp.mean((x - mu) ** 2, axis=-1, keepdims=True)
    return (x - mu) * jax.lax.rsqrt(var + EPS_LN) * gamma + beta


# ----------------------------------------------------------------------------
# Fused per-branch Pallas kernel (one batch TILE per program)
# ----------------------------------------------------------------------------
def branch_kernel(x_ref, mask_ref, wqkv_ref, wo_ref, w1_ref, w2_ref, lvec_ref,
                  pws_ref, pw2_ref, pvec_ref,
                  h_ref, z_ref, s_ref):
    """Fused ConTF branch for one batch tile (TB elements folded into matmul M).

    x_ref    : (TB*S, E)   batch-major rows: element b occupies rows b*S..b*S+S-1
    mask_ref : (TB*S, TB*S) additive attention mask (0 within element, -1e30 across)
    wqkv_ref : (L, E, 3E)  packed Wq|Wk|Wv per encoder layer
    wo_ref   : (L, E, E)   attention output projection
    w1_ref   : (L, E, 2E)  FFN up projection
    w2_ref   : (L, 2E, E)  FFN down projection
    lvec_ref : (L, 8, 3E)  rows: bqkv | bo | ln1_g | ln1_b | b1 | b2 | ln2_g | ln2_b
    pws_ref  : (S*E, 384)  packed [projector_w1 (256) | shift_w zero-padded (128)]
    pw2_ref  : (256, 128)  projector second linear
    pvec_ref : (8, 384)    rows: [pb1|shift_b_pad] | bn_g | bn_b | bn_mean | bn_var | pb2 | 0 | 0
    h_ref    : (TB, S*E)   flattened encoder output
    z_ref    : (TB, 128)   projector output
    s_ref    : (TB, 128)   shift logits (lane-padded; wrapper slices [:, :K])
    """
    M, E = x_ref.shape                       # M = TB * S
    TB = h_ref.shape[0]
    S = M // TB
    L = wqkv_ref.shape[0]
    scale = 1.0 / math.sqrt(E)

    x = x_ref[...]                           # (M, E)
    mask = mask_ref[...]                     # (M, M)

    for l in range(L):                       # static unroll over the 2 encoder layers
        vec = lvec_ref[l]                    # (8, 3E)
        bqkv = vec[0:1, :]
        bo, g1, be1 = vec[1:2, :E], vec[2:3, :E], vec[3:4, :E]
        b1 = vec[4:5, :2 * E]
        b2, g2, be2 = vec[5:6, :E], vec[6:7, :E], vec[7:8, :E]

        # --- self-attention (nhead=1), packed QKV matmul with batch folded in M --
        qkv = jnp.dot(x, wqkv_ref[l], preferred_element_type=jnp.float32) + bqkv
        q, k, v = qkv[:, :E], qkv[:, E:2 * E], qkv[:, 2 * E:]
        # q @ k^T without an explicit transpose; block-diag mask keeps elements separate
        sc = lax.dot_general(q, k, (((1,), (1,)), ((), ())),
                             preferred_element_type=jnp.float32) * scale + mask
        sc = sc - jnp.max(sc, axis=-1, keepdims=True)
        p = jnp.exp(sc)
        p = p / jnp.sum(p, axis=-1, keepdims=True)        # exact softmax
        attn = jnp.dot(p, v, preferred_element_type=jnp.float32)             # (M, E)
        attn = jnp.dot(attn, wo_ref[l], preferred_element_type=jnp.float32) + bo

        h = _layernorm(x + attn, g1, be1)    # residual + LN1 (per position)

        # --- feed-forward ------------------------------------------------------
        ff = jnp.dot(h, w1_ref[l], preferred_element_type=jnp.float32) + b1
        ff = jnp.maximum(ff, 0.0)
        ff = jnp.dot(ff, w2_ref[l], preferred_element_type=jnp.float32) + b2
        x = _layernorm(h + ff, g2, be2)      # residual + LN2

    # --- flatten in registers: lane-concat the S position rows of each element --
    hflat = jnp.concatenate(
        [jnp.concatenate([x[b * S + s: b * S + s + 1, :] for s in range(S)], axis=1)
         for b in range(TB)],
        axis=0)                                           # (TB, S*E)
    h_ref[...] = hflat                                    # single lane-dense store

    # --- fused projector first-linear + shift head (shared LHS, one matmul) -----
    bias1 = pvec_ref[0:1, :]                              # (1, 384) = [pb1 | shift_b_pad]
    z1s = jnp.dot(hflat, pws_ref[...], preferred_element_type=jnp.float32) + bias1
    s_ref[...] = z1s[:, 256:]                             # shift logits (lane-padded)

    # --- projector: BatchNorm1d(eval) -> ReLU -> Linear --------------------------
    bn_g, bn_b = pvec_ref[1:2, :256], pvec_ref[2:3, :256]
    bn_m, bn_v = pvec_ref[3:4, :256], pvec_ref[4:5, :256]
    pb2 = pvec_ref[5:6, :128]
    z1 = (z1s[:, :256] - bn_m) * jax.lax.rsqrt(bn_v + EPS_BN) * bn_g + bn_b
    z1 = jnp.maximum(z1, 0.0)
    z_ref[...] = jnp.dot(z1, pw2_ref[...], preferred_element_type=jnp.float32) + pb2


# ----------------------------------------------------------------------------
# Wrapper: parameter packing + pallas_call plumbing
# ----------------------------------------------------------------------------
def _pad_cols(v, width):
    return jnp.pad(v, ((0, 0), (0, width - v.shape[1])))


def fused_branch(x, layers, proj, shift, max_batch_tile=8):
    """One ConTF branch (encoder x2 + projector + shift head) as one pallas_call."""
    x = x.astype(jnp.float32)
    B, S, E = x.shape
    D = S * E
    K = shift["w"].shape[1]

    # Batch tiling: whole batch in one program when B is small, tiles of 8 otherwise.
    TB = min(B, max_batch_tile)
    G = pl.cdiv(B, TB)
    Bp = G * TB
    if Bp != B:
        x = jnp.pad(x, ((0, Bp - B), (0, 0), (0, 0)))
    M = TB * S

    x2 = x.reshape(Bp * S, E)                             # batch folded into matmul M

    # Block-diagonal additive attention mask (keeps per-element attention exact).
    bid = jnp.repeat(jnp.arange(TB, dtype=jnp.int32), S)
    mask = jnp.where(bid[:, None] == bid[None, :], 0.0, NEG_INF).astype(jnp.float32)

    # Packed per-layer weights / vectors (stacked over the L=2 layers).
    wqkv = jnp.stack([jnp.concatenate([p["wq"], p["wk"], p["wv"]], axis=1) for p in layers])
    wo = jnp.stack([p["wo"] for p in layers])
    w1 = jnp.stack([p["w1"] for p in layers])
    w2 = jnp.stack([p["w2"] for p in layers])
    lvec = jnp.stack([
        jnp.concatenate([
            jnp.concatenate([p["bq"], p["bk"], p["bv"]], axis=1),
            _pad_cols(p["bo"], 3 * E), _pad_cols(p["g1"], 3 * E), _pad_cols(p["be1"], 3 * E),
            _pad_cols(p["b1"], 3 * E), _pad_cols(p["b2"], 3 * E),
            _pad_cols(p["g2"], 3 * E), _pad_cols(p["be2"], 3 * E),
        ], axis=0)
        for p in layers
    ])                                                    # (L, 8, 3E)

    # Projector first linear fused with the shift head: one (D, 384) weight slab.
    pws = jnp.concatenate([proj["w1"], _pad_cols(shift["w"], 128)], axis=1)   # (D, 384)
    pvec = jnp.concatenate([
        jnp.concatenate([proj["b1"], _pad_cols(shift["b"], 128)], axis=1),    # (1, 384)
        _pad_cols(proj["gamma"], 384), _pad_cols(proj["beta"], 384),
        _pad_cols(proj["rmean"], 384), _pad_cols(proj["rvar"], 384),
        _pad_cols(proj["b2"], 384),
        jnp.zeros((2, 384), jnp.float32),
    ], axis=0)                                            # (8, 384)

    weights = [mask, wqkv, wo, w1, w2, lvec, pws, proj["w2"], pvec]

    def _full_spec(a):
        nd = a.ndim
        return pl.BlockSpec(a.shape, lambda g, _nd=nd: (0,) * _nd)

    in_specs = [pl.BlockSpec((M, E), lambda g: (g, 0))] + [_full_spec(w) for w in weights]
    out_specs = [pl.BlockSpec((TB, D), lambda g: (g, 0)),
                 pl.BlockSpec((TB, 128), lambda g: (g, 0)),
                 pl.BlockSpec((TB, 128), lambda g: (g, 0))]
    out_shape = [jax.ShapeDtypeStruct((Bp, D), jnp.float32),
                 jax.ShapeDtypeStruct((Bp, 128), jnp.float32),
                 jax.ShapeDtypeStruct((Bp, 128), jnp.float32)]

    h, z, s_pad = pl.pallas_call(
        branch_kernel,
        grid=(G,),                         # batch-tile axis; "parallel" for megacore/v7x
        in_specs=in_specs,
        out_specs=out_specs,
        out_shape=out_shape,
        compiler_params=pltpu.CompilerParams(dimension_semantics=("parallel",)),
    )(x2, *weights)
    return h[:B], z[:B], s_pad[:B, :K]


def contf_forward(x_in_t, x_in_f, params):
    h_time, z_time, s_time = fused_branch(
        x_in_t, params["enc_t"], params["proj_t"], params["shift_t"])
    h_freq, z_freq, s_freq = fused_branch(
        x_in_f, params["enc_f"], params["proj_f"], params["shift_f"])
    return h_time, z_time, s_time, h_freq, z_freq, s_freq


# ----------------------------------------------------------------------------
# Pure-JAX reference (for correctness check only)
# ----------------------------------------------------------------------------
def _layer_ref(x, p):
    E = x.shape[-1]
    scale = 1.0 / math.sqrt(E)
    q = jnp.matmul(x, p["wq"]) + p["bq"]
    k = jnp.matmul(x, p["wk"]) + p["bk"]
    v = jnp.matmul(x, p["wv"]) + p["bv"]
    s = jnp.einsum("bse,bte->bst", q, k) * scale
    a = jax.nn.softmax(s, axis=-1)
    attn = jnp.einsum("bst,bte->bse", a, v)
    attn = jnp.matmul(attn, p["wo"]) + p["bo"]
    h = _layernorm(x + attn, p["g1"], p["be1"])
    ff = jnp.maximum(jnp.matmul(h, p["w1"]) + p["b1"], 0.0)
    ff = jnp.matmul(ff, p["w2"]) + p["b2"]
    return _layernorm(h + ff, p["g2"], p["be2"])


def _projector_ref(h, p):
    z = jnp.matmul(h, p["w1"]) + p["b1"]
    z = (z - p["rmean"]) * jax.lax.rsqrt(p["rvar"] + EPS_BN) * p["gamma"] + p["beta"]
    z = jnp.maximum(z, 0.0)
    return jnp.matmul(z, p["w2"]) + p["b2"]


def contf_forward_ref(x_in_t, x_in_f, params):
    x = x_in_t.astype(jnp.float32)
    for lp in params["enc_t"]:
        x = _layer_ref(x, lp)
    h_time = x.reshape(x.shape[0], -1)
    z_time = _projector_ref(h_time, params["proj_t"])
    s_time = jnp.matmul(h_time, params["shift_t"]["w"]) + params["shift_t"]["b"]

    f = x_in_f.astype(jnp.float32)
    for lp in params["enc_f"]:
        f = _layer_ref(f, lp)
    h_freq = f.reshape(f.shape[0], -1)
    z_freq = _projector_ref(h_freq, params["proj_f"])
    s_freq = jnp.matmul(h_freq, params["shift_f"]["w"]) + params["shift_f"]["b"]
    return h_time, z_time, s_time, h_freq, z_freq, s_freq


# ----------------------------------------------------------------------------
# Deterministic parameter init (synthetic; no checkpoint loading)
# ----------------------------------------------------------------------------
def _n(key, shape, scale=0.05):
    return scale * jax.random.normal(key, shape, jnp.float32)


def init_encoder_layer(key, E):
    FF = 2 * E
    ks = jax.random.split(key, 16)
    return {
        "wq": _n(ks[0], (E, E)), "wk": _n(ks[1], (E, E)), "wv": _n(ks[2], (E, E)),
        "bq": _n(ks[3], (1, E), 0.01), "bk": _n(ks[4], (1, E), 0.01),
        "bv": _n(ks[5], (1, E), 0.01),
        "wo": _n(ks[6], (E, E)), "bo": _n(ks[7], (1, E), 0.01),
        "g1": 1.0 + _n(ks[8], (1, E), 0.01), "be1": _n(ks[9], (1, E), 0.01),
        "w1": _n(ks[10], (E, FF)), "b1": _n(ks[11], (1, FF), 0.01),
        "w2": _n(ks[12], (FF, E)), "b2": _n(ks[13], (1, E), 0.01),
        "g2": 1.0 + _n(ks[14], (1, E), 0.01), "be2": _n(ks[15], (1, E), 0.01),
    }


def init_projector(key, D):
    ks = jax.random.split(key, 8)
    return {
        "w1": _n(ks[0], (D, 256)), "b1": _n(ks[1], (1, 256), 0.01),
        "gamma": 1.0 + _n(ks[2], (1, 256), 0.01), "beta": _n(ks[3], (1, 256), 0.01),
        "rmean": _n(ks[4], (1, 256), 0.01),
        "rvar": 1.0 + 0.1 * jnp.abs(jax.random.normal(ks[5], (1, 256), jnp.float32)),
        "w2": _n(ks[6], (256, 128)), "b2": _n(ks[7], (1, 128), 0.01),
    }


def init_linear(key, D, K):
    k1, k2 = jax.random.split(key)
    return {"w": _n(k1, (D, K)), "b": _n(k2, (1, K), 0.01)}


# ----------------------------------------------------------------------------
if __name__ == "__main__":
    B = 2
    C_T, L_T = 4, 32        # input_channels,   TSlength_aligned   (time branch)
    C_F, L_F = 8, 16        # input_channels_2, TSlength_aligned_2 (freq branch)
    K_SHIFT, K_SHIFT_F = 3, 5

    key = jax.random.PRNGKey(0)
    k_dt, k_df, k_param = jax.random.split(key, 3)
    x_in_t = jax.random.normal(k_dt, (B, C_T, L_T), jnp.float32)
    x_in_f = jax.random.normal(k_df, (B, C_F, L_F), jnp.float32)

    kp = jax.random.split(k_param, 8)
    params = {
        "enc_t": [init_encoder_layer(kp[0], L_T), init_encoder_layer(kp[1], L_T)],
        "enc_f": [init_encoder_layer(kp[2], L_F), init_encoder_layer(kp[3], L_F)],
        "proj_t": init_projector(kp[4], L_T * C_T),
        "proj_f": init_projector(kp[5], L_F * C_F),
        "shift_t": init_linear(kp[6], L_T * C_T, K_SHIFT),
        "shift_f": init_linear(kp[7], L_F * C_F, K_SHIFT_F),
    }

    outs = jax.block_until_ready(contf_forward(x_in_t, x_in_f, params))
    refs = jax.block_until_ready(contf_forward_ref(x_in_t, x_in_f, params))

    expected_shapes = {
        "h_time": (B, C_T * L_T), "z_time": (B, 128), "s_time": (B, K_SHIFT),
        "h_freq": (B, C_F * L_F), "z_freq": (B, 128), "s_freq": (B, K_SHIFT_F),
    }
    for name, o, r in zip(expected_shapes, outs, refs):
        assert o.shape == expected_shapes[name], (name, o.shape)
        assert bool(jnp.all(jnp.isfinite(o))), f"non-finite output in {name}"
        assert bool(jnp.allclose(o, r, rtol=5e-3, atol=5e-3)), f"mismatch in {name}"

    print("KERNEL_OK")
</pallas_src>

<mosaic_0001>
module attributes {stable_mosaic.version = 11 : i64} {
  func.func @branch_kernel(%arg0: i32, %arg1: memref<8x32xf32, #tpu.memory_space<vmem>>, %arg2: memref<8x8xf32, #tpu.memory_space<vmem>>, %arg3: memref<2x32x96xf32, #tpu.memory_space<vmem>>, %arg4: memref<2x32x32xf32, #tpu.memory_space<vmem>>, %arg5: memref<2x32x64xf32, #tpu.memory_space<vmem>>, %arg6: memref<2x64x32xf32, #tpu.memory_space<vmem>>, %arg7: memref<2x8x96xf32, #tpu.memory_space<vmem>>, %arg8: memref<128x384xf32, #tpu.memory_space<vmem>>, %arg9: memref<256x128xf32, #tpu.memory_space<vmem>>, %arg10: memref<8x384xf32, #tpu.memory_space<vmem>>, %arg11: memref<2x128xf32, #tpu.memory_space<vmem>>, %arg12: memref<2x128xf32, #tpu.memory_space<vmem>>, %arg13: memref<2x128xf32, #tpu.memory_space<vmem>>) attributes {dimension_semantics = [#tpu.dimension_semantics<parallel>], iteration_bounds = array<i64: 1>, scalar_prefetch = 0 : i64, scratch_operands = 0 : i64, tpu.core_type = #tpu.core_type<tc>, window_params = [{transform_indices = @transform_0, window_bounds = array<i64: 8, 32>}, {pipeline_mode = #tpu.pipeline_mode<synchronous>, transform_indices = @transform_1, window_bounds = array<i64: 8, 8>}, {pipeline_mode = #tpu.pipeline_mode<synchronous>, transform_indices = @transform_2, window_bounds = array<i64: 2, 32, 96>}, {pipeline_mode = #tpu.pipeline_mode<synchronous>, transform_indices = @transform_3, window_bounds = array<i64: 2, 32, 32>}, {pipeline_mode = #tpu.pipeline_mode<synchronous>, transform_indices = @transform_4, window_bounds = array<i64: 2, 32, 64>}, {pipeline_mode = #tpu.pipeline_mode<synchronous>, transform_indices = @transform_5, window_bounds = array<i64: 2, 64, 32>}, {pipeline_mode = #tpu.pipeline_mode<synchronous>, transform_indices = @transform_6, window_bounds = array<i64: 2, 8, 96>}, {pipeline_mode = #tpu.pipeline_mode<synchronous>, transform_indices = @transform_7, window_bounds = array<i64: 128, 384>}, {pipeline_mode = #tpu.pipeline_mode<synchronous>, transform_indices = @transform_8, window_bounds = array<i64: 256, 128>}, {pipeline_mode = #tpu.pipeline_mode<synchronous>, transform_indices = @transform_9, window_bounds = array<i64: 8, 384>}, {transform_indices = @transform_10, window_bounds = array<i64: 2, 128>}, {transform_indices = @transform_11, window_bounds = array<i64: 2, 128>}, {transform_indices = @transform_12, window_bounds = array<i64: 2, 128>}]} {
    %c0 = arith.constant 0 : index
    %c0_0 = arith.constant 0 : index
    %0 = vector.load %arg1[%c0, %c0_0] : memref<8x32xf32, #tpu.memory_space<vmem>>, vector<8x32xf32>
    %c0_1 = arith.constant 0 : index
    %c0_2 = arith.constant 0 : index
    %1 = vector.load %arg2[%c0_1, %c0_2] : memref<8x8xf32, #tpu.memory_space<vmem>>, vector<8x8xf32>
    %c0_3 = arith.constant 0 : index
    %c0_4 = arith.constant 0 : index
    %c0_5 = arith.constant 0 : index
    %2 = vector.load %arg7[%c0_3, %c0_4, %c0_5] : memref<2x8x96xf32, #tpu.memory_space<vmem>>, vector<1x8x96xf32>
    %3 = vector.shape_cast %2 : vector<1x8x96xf32> to vector<8x96xf32>
    %4 = vector.extract_strided_slice %3 {offsets = [0, 0], sizes = [1, 96], strides = [1, 1]} : vector<8x96xf32> to vector<1x96xf32>
    %5 = vector.extract_strided_slice %3 {offsets = [1, 0], sizes = [1, 32], strides = [1, 1]} : vector<8x96xf32> to vector<1x32xf32>
    %6 = vector.extract_strided_slice %3 {offsets = [2, 0], sizes = [1, 32], strides = [1, 1]} : vector<8x96xf32> to vector<1x32xf32>
    %7 = vector.extract_strided_slice %3 {offsets = [3, 0], sizes = [1, 32], strides = [1, 1]} : vector<8x96xf32> to vector<1x32xf32>
    %8 = vector.extract_strided_slice %3 {offsets = [4, 0], sizes = [1, 64], strides = [1, 1]} : vector<8x96xf32> to vector<1x64xf32>
    %9 = vector.extract_strided_slice %3 {offsets = [5, 0], sizes = [1, 32], strides = [1, 1]} : vector<8x96xf32> to vector<1x32xf32>
    %10 = vector.extract_strided_slice %3 {offsets = [6, 0], sizes = [1, 32], strides = [1, 1]} : vector<8x96xf32> to vector<1x32xf32>
    %11 = vector.extract_strided_slice %3 {offsets = [7, 0], sizes = [1, 32], strides = [1, 1]} : vector<8x96xf32> to vector<1x32xf32>
    %c0_6 = arith.constant 0 : index
    %c0_7 = arith.constant 0 : index
    %c0_8 = arith.constant 0 : index
    %12 = vector.load %arg3[%c0_6, %c0_7, %c0_8] : memref<2x32x96xf32, #tpu.memory_space<vmem>>, vector<1x32x96xf32>
    %13 = vector.shape_cast %12 : vector<1x32x96xf32> to vector<32x96xf32>
    %cst = arith.constant dense<0.000000e+00> : vector<8x96xf32>
    %14 = tpu.matmul %0, %13, %cst {dimension_numbers = #tpu.dot_dimension_numbers<[1], [0], [0], [1], [0, 0, 1, 1], [], []>} : vector<8x32xf32>, vector<32x96xf32>, vector<8x96xf32> -> vector<8x96xf32>
    %15 = vector.broadcast %4 : vector<1x96xf32> to vector<8x96xf32>
    %16 = arith.addf %14, %15 : vector<8x96xf32>
    %17 = vector.extract_strided_slice %16 {offsets = [0, 0], sizes = [8, 32], strides = [1, 1]} : vector<8x96xf32> to vector<8x32xf32>
    %18 = vector.extract_strided_slice %16 {offsets = [0, 32], sizes = [8, 32], strides = [1, 1]} : vector<8x96xf32> to vector<8x32xf32>
    %19 = vector.extract_strided_slice %16 {offsets = [0, 64], sizes = [8, 32], strides = [1, 1]} : vector<8x96xf32> to vector<8x32xf32>
    %cst_9 = arith.constant dense<0.000000e+00> : vector<8x8xf32>
    %20 = tpu.matmul %17, %18, %cst_9 {dimension_numbers = #tpu.dot_dimension_numbers<[1], [1], [0], [0], [0, 0, 1, 0], [], []>} : vector<8x32xf32>, vector<8x32xf32>, vector<8x8xf32> -> vector<8x8xf32>
    %cst_10 = arith.constant 0.176776692 : f32
    %21 = vector.broadcast %cst_10 : f32 to vector<8x8xf32>
    %22 = arith.mulf %20, %21 : vector<8x8xf32>
    %23 = arith.addf %22, %1 : vector<8x8xf32>
    %cst_11 = arith.constant dense<0xFF800000> : vector<8xf32>
    %24 = vector.multi_reduction <maximumf>, %23, %cst_11 [1] : vector<8x8xf32> to vector<8xf32>
    %25 = vector.shape_cast %24 : vector<8xf32> to vector<8x1xf32>
    %26 = vector.broadcast %25 : vector<8x1xf32> to vector<8x8xf32>
    %27 = arith.subf %23, %26 : vector<8x8xf32>
    %28 = math.exp %27 : vector<8x8xf32>
    %cst_12 = arith.constant dense<0.000000e+00> : vector<8xf32>
    %29 = vector.multi_reduction <add>, %28, %cst_12 [1] : vector<8x8xf32> to vector<8xf32>
    %30 = vector.shape_cast %29 : vector<8xf32> to vector<8x1xf32>
    %31 = vector.broadcast %30 : vector<8x1xf32> to vector<8x8xf32>
    %32 = arith.divf %28, %31 : vector<8x8xf32>
    %cst_13 = arith.constant dense<0.000000e+00> : vector<8x32xf32>
    %33 = tpu.matmul %32, %19, %cst_13 {dimension_numbers = #tpu.dot_dimension_numbers<[1], [0], [0], [1], [0, 0, 1, 1], [], []>} : vector<8x8xf32>, vector<8x32xf32>, vector<8x32xf32> -> vector<8x32xf32>
    %c0_14 = arith.constant 0 : index
    %c0_15 = arith.constant 0 : index
    %c0_16 = arith.constant 0 : index
    %34 = vector.load %arg4[%c0_14, %c0_15, %c0_16] : memref<2x32x32xf32, #tpu.memory_space<vmem>>, vector<1x32x32xf32>
    %35 = vector.shape_cast %34 : vector<1x32x32xf32> to vector<32x32xf32>
    %cst_17 = arith.constant dense<0.000000e+00> : vector<8x32xf32>
    %36 = tpu.matmul %33, %35, %cst_17 {dimension_numbers = #tpu.dot_dimension_numbers<[1], [0], [0], [1], [0, 0, 1, 1], [], []>} : vector<8x32xf32>, vector<32x32xf32>, vector<8x32xf32> -> vector<8x32xf32>
    %37 = vector.broadcast %5 : vector<1x32xf32> to vector<8x32xf32>
    %38 = arith.addf %36, %37 : vector<8x32xf32>
    %39 = arith.addf %0, %38 : vector<8x32xf32>
    %cst_18 = arith.constant dense<0.000000e+00> : vector<8xf32>
    %40 = vector.multi_reduction <add>, %39, %cst_18 [1] : vector<8x32xf32> to vector<8xf32>
    %41 = vector.shape_cast %40 : vector<8xf32> to vector<8x1xf32>
    %cst_19 = arith.constant 3.200000e+01 : f32
    %42 = vector.broadcast %cst_19 : f32 to vector<8x1xf32>
    %43 = arith.divf %41, %42 : vector<8x1xf32>
    %44 = vector.broadcast %43 : vector<8x1xf32> to vector<8x32xf32>
    %45 = arith.subf %39, %44 : vector<8x32xf32>
    %46 = arith.mulf %45, %45 : vector<8x32xf32>
    %cst_20 = arith.constant dense<0.000000e+00> : vector<8xf32>
    %47 = vector.multi_reduction <add>, %46, %cst_20 [1] : vector<8x32xf32> to vector<8xf32>
    %48 = vector.shape_cast %47 : vector<8xf32> to vector<8x1xf32>
    %cst_21 = arith.constant 3.200000e+01 : f32
    %49 = vector.broadcast %cst_21 : f32 to vector<8x1xf32>
    %50 = arith.divf %48, %49 : vector<8x1xf32>
    %51 = vector.broadcast %43 : vector<8x1xf32> to vector<8x32xf32>
    %52 = arith.subf %39, %51 : vector<8x32xf32>
    %cst_22 = arith.constant 9.99999974E-6 : f32
    %53 = vector.broadcast %cst_22 : f32 to vector<8x1xf32>
    %54 = arith.addf %50, %53 : vector<8x1xf32>
    %55 = math.rsqrt %54 : vector<8x1xf32>
    %56 = vector.broadcast %55 : vector<8x1xf32> to vector<8x32xf32>
    %57 = arith.mulf %52, %56 : vector<8x32xf32>
    %58 = vector.broadcast %6 : vector<1x32xf32> to vector<8x32xf32>
    %59 = arith.mulf %57, %58 : vector<8x32xf32>
    %60 = vector.broadcast %7 : vector<1x32xf32> to vector<8x32xf32>
    %61 = arith.addf %59, %60 : vector<8x32xf32>
    %c0_23 = arith.constant 0 : index
    %c0_24 = arith.constant 0 : index
    %c0_25 = arith.constant 0 : index
    %62 = vector.load %arg5[%c0_23, %c0_24, %c0_25] : memref<2x32x64xf32, #tpu.memory_space<vmem>>, vector<1x32x64xf32>
    %63 = vector.shape_cast %62 : vector<1x32x64xf32> to vector<32x64xf32>
    %cst_26 = arith.constant dense<0.000000e+00> : vector<8x64xf32>
    %64 = tpu.matmul %61, %63, %cst_26 {dimension_numbers = #tpu.dot_dimension_numbers<[1], [0], [0], [1], [0, 0, 1, 1], [], []>} : vector<8x32xf32>, vector<32x64xf32>, vector<8x64xf32> -> vector<8x64xf32>
    %65 = vector.broadcast %8 : vector<1x64xf32> to vector<8x64xf32>
    %66 = arith.addf %64, %65 : vector<8x64xf32>
    %cst_27 = arith.constant 0.000000e+00 : f32
    %67 = vector.broadcast %cst_27 : f32 to vector<8x64xf32>
    %68 = arith.maximumf %66, %67 : vector<8x64xf32>
    %c0_28 = arith.constant 0 : index
    %c0_29 = arith.constant 0 : index
    %c0_30 = arith.constant 0 : index
    %69 = vector.load %arg6[%c0_28, %c0_29, %c0_30] : memref<2x64x32xf32, #tpu.memory_space<vmem>>, vector<1x64x32xf32>
    %70 = vector.shape_cast %69 : vector<1x64x32xf32> to vector<64x32xf32>
    %cst_31 = arith.constant dense<0.000000e+00> : vector<8x32xf32>
    %71 = tpu.matmul %68, %70, %cst_31 {dimension_numbers = #tpu.dot_dimension_numbers<[1], [0], [0], [1], [0, 0, 1, 1], [], []>} : vector<8x64xf32>, vector<64x32xf32>, vector<8x32xf32> -> vector<8x32xf32>
    %72 = vector.broadcast %9 : vector<1x32xf32> to vector<8x32xf32>
    %73 = arith.addf %71, %72 : vector<8x32xf32>
    %74 = arith.addf %61, %73 : vector<8x32xf32>
    %cst_32 = arith.constant dense<0.000000e+00> : vector<8xf32>
    %75 = vector.multi_reduction <add>, %74, %cst_32 [1] : vector<8x32xf32> to vector<8xf32>
    %76 = vector.shape_cast %75 : vector<8xf32> to vector<8x1xf32>
    %cst_33 = arith.constant 3.200000e+01 : f32
    %77 = vector.broadcast %cst_33 : f32 to vector<8x1xf32>
    %78 = arith.divf %76, %77 : vector<8x1xf32>
    %79 = vector.broadcast %78 : vector<8x1xf32> to vector<8x32xf32>
    %80 = arith.subf %74, %79 : vector<8x32xf32>
    %81 = arith.mulf %80, %80 : vector<8x32xf32>
    %cst_34 = arith.constant dense<0.000000e+00> : vector<8xf32>
    %82 = vector.multi_reduction <add>, %81, %cst_34 [1] : vector<8x32xf32> to vector<8xf32>
    %83 = vector.shape_cast %82 : vector<8xf32> to vector<8x1xf32>
    %cst_35 = arith.constant 3.200000e+01 : f32
    %84 = vector.broadcast %cst_35 : f32 to vector<8x1xf32>
    %85 = arith.divf %83, %84 : vector<8x1xf32>
    %86 = vector.broadcast %78 : vector<8x1xf32> to vector<8x32xf32>
    %87 = arith.subf %74, %86 : vector<8x32xf32>
    %cst_36 = arith.constant 9.99999974E-6 : f32
    %88 = vector.broadcast %cst_36 : f32 to vector<8x1xf32>
    %89 = arith.addf %85, %88 : vector<8x1xf32>
    %90 = math.rsqrt %89 : vector<8x1xf32>
    %91 = vector.broadcast %90 : vector<8x1xf32> to vector<8x32xf32>
    %92 = arith.mulf %87, %91 : vector<8x32xf32>
    %93 = vector.broadcast %10 : vector<1x32xf32> to vector<8x32xf32>
    %94 = arith.mulf %92, %93 : vector<8x32xf32>
    %95 = vector.broadcast %11 : vector<1x32xf32> to vector<8x32xf32>
    %96 = arith.addf %94, %95 : vector<8x32xf32>
    %c1 = arith.constant 1 : index
    %c0_37 = arith.constant 0 : index
    %c0_38 = arith.constant 0 : index
    %97 = vector.load %arg7[%c1, %c0_37, %c0_38] : memref<2x8x96xf32, #tpu.memory_space<vmem>>, vector<1x8x96xf32>
    %98 = vector.shape_cast %97 : vector<1x8x96xf32> to vector<8x96xf32>
    %99 = vector.extract_strided_slice %98 {offsets = [0, 0], sizes = [1, 96], strides = [1, 1]} : vector<8x96xf32> to vector<1x96xf32>
    %100 = vector.extract_strided_slice %98 {offsets = [1, 0], sizes = [1, 32], strides = [1, 1]} : vector<8x96xf32> to vector<1x32xf32>
    %101 = vector.extract_strided_slice %98 {offsets = [2, 0], sizes = [1, 32], strides = [1, 1]} : vector<8x96xf32> to vector<1x32xf32>
    %102 = vector.extract_strided_slice %98 {offsets = [3, 0], sizes = [1, 32], strides = [1, 1]} : vector<8x96xf32> to vector<1x32xf32>
    %103 = vector.extract_strided_slice %98 {offsets = [4, 0], sizes = [1, 64], strides = [1, 1]} : vector<8x96xf32> to vector<1x64xf32>
    %104 = vector.extract_strided_slice %98 {offsets = [5, 0], sizes = [1, 32], strides = [1, 1]} : vector<8x96xf32> to vector<1x32xf32>
    %105 = vector.extract_strided_slice %98 {offsets = [6, 0], sizes = [1, 32], strides = [1, 1]} : vector<8x96xf32> to vector<1x32xf32>
    %106 = vector.extract_strided_slice %98 {offsets = [7, 0], sizes = [1, 32], strides = [1, 1]} : vector<8x96xf32> to vector<1x32xf32>
    %c1_39 = arith.constant 1 : index
    %c0_40 = arith.constant 0 : index
    %c0_41 = arith.constant 0 : index
    %107 = vector.load %arg3[%c1_39, %c0_40, %c0_41] : memref<2x32x96xf32, #tpu.memory_space<vmem>>, vector<1x32x96xf32>
    %108 = vector.shape_cast %107 : vector<1x32x96xf32> to vector<32x96xf32>
    %cst_42 = arith.constant dense<0.000000e+00> : vector<8x96xf32>
    %109 = tpu.matmul %96, %108, %cst_42 {dimension_numbers = #tpu.dot_dimension_numbers<[1], [0], [0], [1], [0, 0, 1, 1], [], []>} : vector<8x32xf32>, vector<32x96xf32>, vector<8x96xf32> -> vector<8x96xf32>
    %110 = vector.broadcast %99 : vector<1x96xf32> to vector<8x96xf32>
    %111 = arith.addf %109, %110 : vector<8x96xf32>
    %112 = vector.extract_strided_slice %111 {offsets = [0, 0], sizes = [8, 32], strides = [1, 1]} : vector<8x96xf32> to vector<8x32xf32>
    %113 = vector.extract_strided_slice %111 {offsets = [0, 32], sizes = [8, 32], strides = [1, 1]} : vector<8x96xf32> to vector<8x32xf32>
    %114 = vector.extract_strided_slice %111 {offsets = [0, 64], sizes = [8, 32], strides = [1, 1]} : vector<8x96xf32> to vector<8x32xf32>
    %cst_43 = arith.constant dense<0.000000e+00> : vector<8x8xf32>
    %115 = tpu.matmul %112, %113, %cst_43 {dimension_numbers = #tpu.dot_dimension_numbers<[1], [1], [0], [0], [0, 0, 1, 0], [], []>} : vector<8x32xf32>, vector<8x32xf32>, vector<8x8xf32> -> vector<8x8xf32>
    %cst_44 = arith.constant 0.176776692 : f32
    %116 = vector.broadcast %cst_44 : f32 to vector<8x8xf32>
    %117 = arith.mulf %115, %116 : vector<8x8xf32>
    %118 = arith.addf %117, %1 : vector<8x8xf32>
    %cst_45 = arith.constant dense<0xFF800000> : vector<8xf32>
    %119 = vector.multi_reduction <maximumf>, %118, %cst_45 [1] : vector<8x8xf32> to vector<8xf32>
    %120 = vector.shape_cast %119 : vector<8xf32> to vector<8x1xf32>
    %121 = vector.broadcast %120 : vector<8x1xf32> to vector<8x8xf32>
    %122 = arith.subf %118, %121 : vector<8x8xf32>
    %123 = math.exp %122 : vector<8x8xf32>
    %cst_46 = arith.constant dense<0.000000e+00> : vector<8xf32>
    %124 = vector.multi_reduction <add>, %123, %cst_46 [1] : vector<8x8xf32> to vector<8xf32>
    %125 = vector.shape_cast %124 : vector<8xf32> to vector<8x1xf32>
    %126 = vector.broadcast %125 : vector<8x1xf32> to vector<8x8xf32>
    %127 = arith.divf %123, %126 : vector<8x8xf32>
    %cst_47 = arith.constant dense<0.000000e+00> : vector<8x32xf32>
    %128 = tpu.matmul %127, %114, %cst_47 {dimension_numbers = #tpu.dot_dimension_numbers<[1], [0], [0], [1], [0, 0, 1, 1], [], []>} : vector<8x8xf32>, vector<8x32xf32>, vector<8x32xf32> -> vector<8x32xf32>
    %c1_48 = arith.constant 1 : index
    %c0_49 = arith.constant 0 : index
    %c0_50 = arith.constant 0 : index
    %129 = vector.load %arg4[%c1_48, %c0_49, %c0_50] : memref<2x32x32xf32, #tpu.memory_space<vmem>>, vector<1x32x32xf32>
    %130 = vector.shape_cast %129 : vector<1x32x32xf32> to vector<32x32xf32>
    %cst_51 = arith.constant dense<0.000000e+00> : vector<8x32xf32>
    %131 = tpu.matmul %128, %130, %cst_51 {dimension_numbers = #tpu.dot_dimension_numbers<[1], [0], [0], [1], [0, 0, 1, 1], [], []>} : vector<8x32xf32>, vector<32x32xf32>, vector<8x32xf32> -> vector<8x32xf32>
    %132 = vector.broadcast %100 : vector<1x32xf32> to vector<8x32xf32>
    %133 = arith.addf %131, %132 : vector<8x32xf32>
    %134 = arith.addf %96, %133 : vector<8x32xf32>
    %cst_52 = arith.constant dense<0.000000e+00> : vector<8xf32>
    %135 = vector.multi_reduction <add>, %134, %cst_52 [1] : vector<8x32xf32> to vector<8xf32>
    %136 = vector.shape_cast %135 : vector<8xf32> to vector<8x1xf32>
    %cst_53 = arith.constant 3.200000e+01 : f32
    %137 = vector.broadcast %cst_53 : f32 to vector<8x1xf32>
    %138 = arith.divf %136, %137 : vector<8x1xf32>
    %139 = vector.broadcast %138 : vector<8x1xf32> to vector<8x32xf32>
    %140 = arith.subf %134, %139 : vector<8x32xf32>
    %141 = arith.mulf %140, %140 : vector<8x32xf32>
    %cst_54 = arith.constant dense<0.000000e+00> : vector<8xf32>
    %142 = vector.multi_reduction <add>, %141, %cst_54 [1] : vector<8x32xf32> to vector<8xf32>
    %143 = vector.shape_cast %142 : vector<8xf32> to vector<8x1xf32>
    %cst_55 = arith.constant 3.200000e+01 : f32
    %144 = vector.broadcast %cst_55 : f32 to vector<8x1xf32>
    %145 = arith.divf %143, %144 : vector<8x1xf32>
    %146 = vector.broadcast %138 : vector<8x1xf32> to vector<8x32xf32>
    %147 = arith.subf %134, %146 : vector<8x32xf32>
    %cst_56 = arith.constant 9.99999974E-6 : f32
    %148 = vector.broadcast %cst_56 : f32 to vector<8x1xf32>
    %149 = arith.addf %145, %148 : vector<8x1xf32>
    %150 = math.rsqrt %149 : vector<8x1xf32>
    %151 = vector.broadcast %150 : vector<8x1xf32> to vector<8x32xf32>
    %152 = arith.mulf %147, %151 : vector<8x32xf32>
    %153 = vector.broadcast %101 : vector<1x32xf32> to vector<8x32xf32>
    %154 = arith.mulf %152, %153 : vector<8x32xf32>
    %155 = vector.broadcast %102 : vector<1x32xf32> to vector<8x32xf32>
    %156 = arith.addf %154, %155 : vector<8x32xf32>
    %c1_57 = arith.constant 1 : index
    %c0_58 = arith.constant 0 : index
    %c0_59 = arith.constant 0 : index
    %157 = vector.load %arg5[%c1_57, %c0_58, %c0_59] : memref<2x32x64xf32, #tpu.memory_space<vmem>>, vector<1x32x64xf32>
    %158 = vector.shape_cast %157 : vector<1x32x64xf32> to vector<32x64xf32>
    %cst_60 = arith.constant dense<0.000000e+00> : vector<8x64xf32>
    %159 = tpu.matmul %156, %158, %cst_60 {dimension_numbers = #tpu.dot_dimension_numbers<[1], [0], [0], [1], [0, 0, 1, 1], [], []>} : vector<8x32xf32>, vector<32x64xf32>, vector<8x64xf32> -> vector<8x64xf32>
    %160 = vector.broadcast %103 : vector<1x64xf32> to vector<8x64xf32>
    %161 = arith.addf %159, %160 : vector<8x64xf32>
    %cst_61 = arith.constant 0.000000e+00 : f32
    %162 = vector.broadcast %cst_61 : f32 to vector<8x64xf32>
    %163 = arith.maximumf %161, %162 : vector<8x64xf32>
    %c1_62 = arith.constant 1 : index
    %c0_63 = arith.constant 0 : index
    %c0_64 = arith.constant 0 : index
    %164 = vector.load %arg6[%c1_62, %c0_63, %c0_64] : memref<2x64x32xf32, #tpu.memory_space<vmem>>, vector<1x64x32xf32>
    %165 = vector.shape_cast %164 : vector<1x64x32xf32> to vector<64x32xf32>
    %cst_65 = arith.constant dense<0.000000e+00> : vector<8x32xf32>
    %166 = tpu.matmul %163, %165, %cst_65 {dimension_numbers = #tpu.dot_dimension_numbers<[1], [0], [0], [1], [0, 0, 1, 1], [], []>} : vector<8x64xf32>, vector<64x32xf32>, vector<8x32xf32> -> vector<8x32xf32>
    %167 = vector.broadcast %104 : vector<1x32xf32> to vector<8x32xf32>
    %168 = arith.addf %166, %167 : vector<8x32xf32>
    %169 = arith.addf %156, %168 : vector<8x32xf32>
    %cst_66 = arith.constant dense<0.000000e+00> : vector<8xf32>
    %170 = vector.multi_reduction <add>, %169, %cst_66 [1] : vector<8x32xf32> to vector<8xf32>
    %171 = vector.shape_cast %170 : vector<8xf32> to vector<8x1xf32>
    %cst_67 = arith.constant 3.200000e+01 : f32
    %172 = vector.broadcast %cst_67 : f32 to vector<8x1xf32>
    %173 = arith.divf %171, %172 : vector<8x1xf32>
    %174 = vector.broadcast %173 : vector<8x1xf32> to vector<8x32xf32>
    %175 = arith.subf %169, %174 : vector<8x32xf32>
    %176 = arith.mulf %175, %175 : vector<8x32xf32>
    %cst_68 = arith.constant dense<0.000000e+00> : vector<8xf32>
    %177 = vector.multi_reduction <add>, %176, %cst_68 [1] : vector<8x32xf32> to vector<8xf32>
    %178 = vector.shape_cast %177 : vector<8xf32> to vector<8x1xf32>
    %cst_69 = arith.constant 3.200000e+01 : f32
    %179 = vector.broadcast %cst_69 : f32 to vector<8x1xf32>
    %180 = arith.divf %178, %179 : vector<8x1xf32>
    %181 = vector.broadcast %173 : vector<8x1xf32> to vector<8x32xf32>
    %182 = arith.subf %169, %181 : vector<8x32xf32>
    %cst_70 = arith.constant 9.99999974E-6 : f32
    %183 = vector.broadcast %cst_70 : f32 to vector<8x1xf32>
    %184 = arith.addf %180, %183 : vector<8x1xf32>
    %185 = math.rsqrt %184 : vector<8x1xf32>
    %186 = vector.broadcast %185 : vector<8x1xf32> to vector<8x32xf32>
    %187 = arith.mulf %182, %186 : vector<8x32xf32>
    %188 = vector.broadcast %105 : vector<1x32xf32> to vector<8x32xf32>
    %189 = arith.mulf %187, %188 : vector<8x32xf32>
    %190 = vector.broadcast %106 : vector<1x32xf32> to vector<8x32xf32>
    %191 = arith.addf %189, %190 : vector<8x32xf32>
    %192 = vector.extract_strided_slice %191 {offsets = [0, 0], sizes = [1, 32], strides = [1, 1]} : vector<8x32xf32> to vector<1x32xf32>
    %193 = vector.extract_strided_slice %191 {offsets = [1, 0], sizes = [1, 32], strides = [1, 1]} : vector<8x32xf32> to vector<1x32xf32>
    %194 = vector.extract_strided_slice %191 {offsets = [2, 0], sizes = [1, 32], strides = [1, 1]} : vector<8x32xf32> to vector<1x32xf32>
    %195 = vector.extract_strided_slice %191 {offsets = [3, 0], sizes = [1, 32], strides = [1, 1]} : vector<8x32xf32> to vector<1x32xf32>
    %196 = tpu.concatenate %192, %193, %194, %195 in 1 : vector<1x32xf32>, vector<1x32xf32>, vector<1x32xf32>, vector<1x32xf32> -> vector<1x128xf32>
    %197 = vector.extract_strided_slice %191 {offsets = [4, 0], sizes = [1, 32], strides = [1, 1]} : vector<8x32xf32> to vector<1x32xf32>
    %198 = vector.extract_strided_slice %191 {offsets = [5, 0], sizes = [1, 32], strides = [1, 1]} : vector<8x32xf32> to vector<1x32xf32>
    %199 = vector.extract_strided_slice %191 {offsets = [6, 0], sizes = [1, 32], strides = [1, 1]} : vector<8x32xf32> to vector<1x32xf32>
    %200 = vector.extract_strided_slice %191 {offsets = [7, 0], sizes = [1, 32], strides = [1, 1]} : vector<8x32xf32> to vector<1x32xf32>
    %201 = tpu.concatenate %197, %198, %199, %200 in 1 : vector<1x32xf32>, vector<1x32xf32>, vector<1x32xf32>, vector<1x32xf32> -> vector<1x128xf32>
    %202 = tpu.concatenate %196, %201 in 0 : vector<1x128xf32>, vector<1x128xf32> -> vector<2x128xf32>
    %c0_71 = arith.constant 0 : index
    %c0_72 = arith.constant 0 : index
    %203 = vector.load %arg11[%c0_71, %c0_72] : memref<2x128xf32, #tpu.memory_space<vmem>>, vector<2x128xf32>
    tpu.vector_store %arg11[%c0_71, %c0_72], %202 {strides = array<i32>} : memref<2x128xf32, #tpu.memory_space<vmem>>, vector<2x128xf32>,
    %c0_73 = arith.constant 0 : index
    %c0_74 = arith.constant 0 : index
    %204 = vector.load %arg10[%c0_73, %c0_74] : memref<8x384xf32, #tpu.memory_space<vmem>>, vector<1x384xf32>
    %c0_75 = arith.constant 0 : index
    %c0_76 = arith.constant 0 : index
    %205 = vector.load %arg8[%c0_75, %c0_76] : memref<128x384xf32, #tpu.memory_space<vmem>>, vector<128x384xf32>
    %cst_77 = arith.constant dense<0.000000e+00> : vector<2x384xf32>
    %206 = tpu.matmul %202, %205, %cst_77 {dimension_numbers = #tpu.dot_dimension_numbers<[1], [0], [0], [1], [0, 0, 1, 1], [], []>} : vector<2x128xf32>, vector<128x384xf32>, vector<2x384xf32> -> vector<2x384xf32>
    %207 = vector.broadcast %204 : vector<1x384xf32> to vector<2x384xf32>
    %208 = arith.addf %206, %207 : vector<2x384xf32>
    %209 = vector.extract_strided_slice %208 {offsets = [0, 256], sizes = [2, 128], strides = [1, 1]} : vector<2x384xf32> to vector<2x128xf32>
    %c0_78 = arith.constant 0 : index
    %c0_79 = arith.constant 0 : index
    %210 = vector.load %arg13[%c0_78, %c0_79] : memref<2x128xf32, #tpu.memory_space<vmem>>, vector<2x128xf32>
    tpu.vector_store %arg13[%c0_78, %c0_79], %209 {strides = array<i32>} : memref<2x128xf32, #tpu.memory_space<vmem>>, vector<2x128xf32>,
    %c1_80 = arith.constant 1 : index
    %c0_81 = arith.constant 0 : index
    %211 = vector.load %arg10[%c1_80, %c0_81] : memref<8x384xf32, #tpu.memory_space<vmem>>, vector<1x256xf32>
    %c2 = arith.constant 2 : index
    %c0_82 = arith.constant 0 : index
    %212 = vector.load %arg10[%c2, %c0_82] : memref<8x384xf32, #tpu.memory_space<vmem>>, vector<1x256xf32>
    %c3 = arith.constant 3 : index
    %c0_83 = arith.constant 0 : index
    %213 = vector.load %arg10[%c3, %c0_83] : memref<8x384xf32, #tpu.memory_space<vmem>>, vector<1x256xf32>
    %c4 = arith.constant 4 : index
    %c0_84 = arith.constant 0 : index
    %214 = vector.load %arg10[%c4, %c0_84] : memref<8x384xf32, #tpu.memory_space<vmem>>, vector<1x256xf32>
    %c5 = arith.constant 5 : index
    %c0_85 = arith.constant 0 : index
    %215 = vector.load %arg10[%c5, %c0_85] : memref<8x384xf32, #tpu.memory_space<vmem>>, vector<1x128xf32>
    %216 = vector.extract_strided_slice %208 {offsets = [0, 0], sizes = [2, 256], strides = [1, 1]} : vector<2x384xf32> to vector<2x256xf32>
    %217 = vector.broadcast %213 : vector<1x256xf32> to vector<2x256xf32>
    %218 = arith.subf %216, %217 : vector<2x256xf32>
    %cst_86 = arith.constant 9.99999974E-6 : f32
    %219 = vector.broadcast %cst_86 : f32 to vector<1x256xf32>
    %220 = arith.addf %214, %219 : vector<1x256xf32>
    %221 = math.rsqrt %220 : vector<1x256xf32>
    %222 = vector.broadcast %221 : vector<1x256xf32> to vector<2x256xf32>
    %223 = arith.mulf %218, %222 : vector<2x256xf32>
    %224 = vector.broadcast %211 : vector<1x256xf32> to vector<2x256xf32>
    %225 = arith.mulf %223, %224 : vector<2x256xf32>
    %226 = vector.broadcast %212 : vector<1x256xf32> to vector<2x256xf32>
    %227 = arith.addf %225, %226 : vector<2x256xf32>
    %cst_87 = arith.constant 0.000000e+00 : f32
    %228 = vector.broadcast %cst_87 : f32 to vector<2x256xf32>
    %229 = arith.maximumf %227, %228 : vector<2x256xf32>
    %c0_88 = arith.constant 0 : index
    %c0_89 = arith.constant 0 : index
    %230 = vector.load %arg9[%c0_88, %c0_89] : memref<256x128xf32, #tpu.memory_space<vmem>>, vector<256x128xf32>
    %cst_90 = arith.constant dense<0.000000e+00> : vector<2x128xf32>
    %231 = tpu.matmul %229, %230, %cst_90 {dimension_numbers = #tpu.dot_dimension_numbers<[1], [0], [0], [1], [0, 0, 1, 1], [], []>} : vector<2x256xf32>, vector<256x128xf32>, vector<2x128xf32> -> vector<2x128xf32>
    %232 = vector.broadcast %215 : vector<1x128xf32> to vector<2x128xf32>
    %233 = arith.addf %231, %232 : vector<2x128xf32>
    %c0_91 = arith.constant 0 : index
    %c0_92 = arith.constant 0 : index
    %234 = vector.load %arg12[%c0_91, %c0_92] : memref<2x128xf32, #tpu.memory_space<vmem>>, vector<2x128xf32>
    tpu.vector_store %arg12[%c0_91, %c0_92], %233 {strides = array<i32>} : memref<2x128xf32, #tpu.memory_space<vmem>>, vector<2x128xf32>,
    return
  }
  func.func @transform_0(%arg0: i32) -> (i32, i32) {
    %c0_i32 = arith.constant 0 : i32
    %c0_i32_0 = arith.constant 0 : i32
    return %arg0, %c0_i32 : i32, i32
  }
  func.func @transform_1(%arg0: i32) -> (i32, i32) {
    %c0_i32 = arith.constant 0 : i32
    %c0_i32_0 = arith.constant 0 : i32
    %c0_i32_1 = arith.constant 0 : i32
    return %c0_i32, %c0_i32_0 : i32, i32
  }
  func.func @transform_2(%arg0: i32) -> (i32, i32, i32) {
    %c0_i32 = arith.constant 0 : i32
    %c0_i32_0 = arith.constant 0 : i32
    %c0_i32_1 = arith.constant 0 : i32
    %c0_i32_2 = arith.constant 0 : i32
    return %c0_i32, %c0_i32_0, %c0_i32_1 : i32, i32, i32
  }
  func.func @transform_3(%arg0: i32) -> (i32, i32, i32) {
    %c0_i32 = arith.constant 0 : i32
    %c0_i32_0 = arith.constant 0 : i32
    %c0_i32_1 = arith.constant 0 : i32
    %c0_i32_2 = arith.constant 0 : i32
    return %c0_i32, %c0_i32_0, %c0_i32_1 : i32, i32, i32
  }
  func.func @transform_4(%arg0: i32) -> (i32, i32, i32) {
    %c0_i32 = arith.constant 0 : i32
    %c0_i32_0 = arith.constant 0 : i32
    %c0_i32_1 = arith.constant 0 : i32
    %c0_i32_2 = arith.constant 0 : i32
    return %c0_i32, %c0_i32_0, %c0_i32_1 : i32, i32, i32
  }
  func.func @transform_5(%arg0: i32) -> (i32, i32, i32) {
    %c0_i32 = arith.constant 0 : i32
    %c0_i32_0 = arith.constant 0 : i32
    %c0_i32_1 = arith.constant 0 : i32
    %c0_i32_2 = arith.constant 0 : i32
    return %c0_i32, %c0_i32_0, %c0_i32_1 : i32, i32, i32
  }
  func.func @transform_6(%arg0: i32) -> (i32, i32, i32) {
    %c0_i32 = arith.constant 0 : i32
    %c0_i32_0 = arith.constant 0 : i32
    %c0_i32_1 = arith.constant 0 : i32
    %c0_i32_2 = arith.constant 0 : i32
    return %c0_i32, %c0_i32_0, %c0_i32_1 : i32, i32, i32
  }
  func.func @transform_7(%arg0: i32) -> (i32, i32) {
    %c0_i32 = arith.constant 0 : i32
    %c0_i32_0 = arith.constant 0 : i32
    %c0_i32_1 = arith.constant 0 : i32
    return %c0_i32, %c0_i32_0 : i32, i32
  }
  func.func @transform_8(%arg0: i32) -> (i32, i32) {
    %c0_i32 = arith.constant 0 : i32
    %c0_i32_0 = arith.constant 0 : i32
    %c0_i32_1 = arith.constant 0 : i32
    return %c0_i32, %c0_i32_0 : i32, i32
  }
  func.func @transform_9(%arg0: i32) -> (i32, i32) {
    %c0_i32 = arith.constant 0 : i32
    %c0_i32_0 = arith.constant 0 : i32
    %c0_i32_1 = arith.constant 0 : i32
    return %c0_i32, %c0_i32_0 : i32, i32
  }
  func.func @transform_10(%arg0: i32) -> (i32, i32) {
    %c0_i32 = arith.constant 0 : i32
    %c0_i32_0 = arith.constant 0 : i32
    return %arg0, %c0_i32 : i32, i32
  }
  func.func @transform_11(%arg0: i32) -> (i32, i32) {
    %c0_i32 = arith.constant 0 : i32
    %c0_i32_0 = arith.constant 0 : i32
    return %arg0, %c0_i32 : i32, i32
  }
  func.func @transform_12(%arg0: i32) -> (i32, i32) {
    %c0_i32 = arith.constant 0 : i32
    %c0_i32_0 = arith.constant 0 : i32
    return %arg0, %c0_i32 : i32, i32
  }
}

</mosaic_0001>

<bundles_post_ra>
// kernel: tpu_custom_call.1
= control target key start
LH: loop header
LB: loop body
LE: loop exit
PB: predicated region body
PF: predicated region fallthrough
CT: control target
= control target key end

     0   :  { %18 = vsyncpa [#allocation3], 0  ;;  %s2830_s0 = inlined_call_operand.hbm [shape: f32[8,32], index: 0, kind: input, shape index: {}]   ;;  %s2831_s1 = inlined_call_operand.hbm [shape: f32[8,8], index: 1, kind: input, shape index: {}]   ;;  %s2832_s2 = inlined_call_operand.vmem [shape: f32[2,32,96], index: 2, kind: input, shape index: {}]   ;;  %s2833_s3 = inlined_call_operand.vmem [shape: f32[2,32,32], index: 3, kind: input, shape index: {}]   ;;  %s2834_s4 = inlined_call_operand.vmem [shape: f32[2,32,64], index: 4, kind: input, shape index: {}]   ;;  %s2835_s5 = inlined_call_operand.vmem [shape: f32[2,64,32], index: 5, kind: input, shape index: {}]   ;;  %s2836_s6 = inlined_call_operand.hbm [shape: f32[2,8,96], index: 6, kind: input, shape index: {}]   ;;  %s2837_s7 = inlined_call_operand.hbm [shape: f32[128,384], index: 7, kind: input, shape index: {}]   ;;  %s2838_s8 = inlined_call_operand.hbm [shape: f32[256,128], index: 8, kind: input, shape index: {}]   ;;  %s2839_s9 = inlined_call_operand.vmem [shape: f32[8,384], index: 9, kind: input, shape index: {}]   ;;  %s2840_s10 = inlined_call_operand.hbm [shape: f32[2,128], index: 10, kind: output, shape index: {0}]   ;;  %s2841_s11 = inlined_call_operand.hbm [shape: f32[2,128], index: 11, kind: output, shape index: {1}]   ;;  %s2842_s12 = inlined_call_operand.hbm [shape: f32[2,128], index: 12, kind: output, shape index: {2}]  }
   0x1   :  { %19 = vsyncpa [#allocation6], 0 }
   0x2   :  { %20 = vsyncpa [#allocation9], 0 }
   0x3   :  { %21 = vsyncpa [#allocation4], 0 }
   0x4   :  { %22 = vsyncpa [#allocation13], 0  ;;  %s2320_s21 = smov [#allocation5]   ;;  %s2321_s23 = smov [#allocation8]  }
   0x5   :  { %s39_s22 = sshll.u32 %s2320_s21, 4  ;;  %s68_s24 = sshll.u32 %s2321_s23, 4  ;;  %s40_s22 = int_to_ptr.vmem [resolvable:$true] %s39_s22  ;;  %s2403_s24 = int_to_ptr.vmem [resolvable:$true] %s68_s24 }
   0x6   :  { %s2134_s27 = scalar_lea.hbm %s2831_s1, 128 }
   0x7   :  { %p2135_p0 = scmp.ne.s32.totalorder %s2831_s1, %s2134_s27  ;;  %p2138_p1 = scmp.lt.u32.totalorder %s2134_s27, %s2831_s1 }
   0x9   :  { %p2140_p2 = pnand %p2138_p1, %p2135_p0 }
   0xb   :  { %2143 = shalt.err (!%p2140_p2)
}
   0xc   :  { %s2144_s14 = scalar_lea.vmem %s40_s22, 128  ;;  %p2149_p4 = scmp.lt.s32.totalorder %s40_s22, %s40_s22 }
   0xd   :  { %p2145_p3 = scmp.ne.s32.totalorder %s40_s22, %s2144_s14  ;;  %p2150_p5 = scmp.lt.s32.totalorder %s2144_s14, %s2144_s14 }
   0xf   :  { %p2151_p6 = por %p2150_p5, %p2149_p4 }
  0x11   :  { %p2152_p7 = pnand %p2151_p6, %p2145_p3 }
  0x13   :  { %2155 = shalt.err (!%p2152_p7)
}
  0x14   :  { %42 = dma.hbm_to_vmem [thread:$0]  %s2831_s1, 128, %s40_s22, [#allocation6]  }
  0x15   :  { %s2156_s19 = scalar_lea.hbm %s2837_s7, 6144 }
  0x16   :  { %p2157_p8 = scmp.ne.s32.totalorder %s2837_s7, %s2156_s19  ;;  %p2160_p9 = scmp.lt.u32.totalorder %s2156_s19, %s2837_s7 }
  0x18   :  { %p2162_p10 = pnand %p2160_p9, %p2157_p8 }
  0x1a   :  { %2165 = shalt.err (!%p2162_p10)
}
  0x1b   :  { %s2166_s26 = scalar_lea.vmem %s2403_s24, 6144  ;;  %p2171_p12 = scmp.lt.s32.totalorder %s2403_s24, %s2403_s24 }
  0x1c   :  { %p2167_p11 = scmp.ne.s32.totalorder %s2403_s24, %s2166_s26  ;;  %p2172_p13 = scmp.lt.s32.totalorder %s2166_s26, %s2166_s26 }
  0x1e   :  { %p2173_p0 = por %p2172_p13, %p2171_p12 }
  0x20   :  { %p2174_p1 = pnand %p2173_p0, %p2167_p11 }
  0x22   :  { %2177 = shalt.err (!%p2174_p1)
}
  0x23   :  { %s2322_s1 = smov 384   ;;  %s2323_s22 = smov 24  }
  0x24   :  { %74 = dma.hbm_to_vmem [thread:$0]  %s2837_s7, 6144, %s2403_s24, [#allocation9], %s2322_s1, %s2322_s1, %s2323_s22  }
  0x25   :  { %s2324_s29 = smov [#allocation2]   ;;  %s2325_s13 = smov [#allocation7]  }
  0x26   :  { %s29_s30 = sshll.u32 %s2324_s29, 4  ;;  %s56_s14 = sshll.u32 %s2325_s13, 4  ;;  %s30_s30 = int_to_ptr.vmem [resolvable:$true] %s29_s30  ;;  %s2434_s14 = int_to_ptr.vmem [resolvable:$true] %s56_s14 }
  0x27   :  { %s2178_s17 = scalar_lea.hbm %s2830_s0, 128 }
  0x28   :  { %p2179_p2 = scmp.ne.s32.totalorder %s2830_s0, %s2178_s17  ;;  %p2182_p3 = scmp.lt.u32.totalorder %s2178_s17, %s2830_s0 }
  0x2a   :  { %p2184_p4 = pnand %p2182_p3, %p2179_p2 }
  0x2c   :  { %2187 = shalt.err (!%p2184_p4)
}
  0x2d   :  { %s2188_s7 = scalar_lea.vmem %s30_s30, 128  ;;  %p2193_p6 = scmp.lt.s32.totalorder %s30_s30, %s30_s30 }
  0x2e   :  { %p2189_p5 = scmp.ne.s32.totalorder %s30_s30, %s2188_s7  ;;  %p2194_p7 = scmp.lt.s32.totalorder %s2188_s7, %s2188_s7 }
  0x30   :  { %p2195_p8 = por %p2194_p7, %p2193_p6 }
  0x32   :  { %p2196_p9 = pnand %p2195_p8, %p2189_p5 }
  0x34   :  { %2199 = shalt.err (!%p2196_p9)
}
  0x35   :  { %32 = dma.hbm_to_vmem [thread:$0]  %s2830_s0, 128, %s30_s30, [#allocation3]  }
  0x36   :  { %s2200_s1 = scalar_lea.hbm %s2836_s6, 256 }
  0x37   :  { %p2201_p10 = scmp.ne.s32.totalorder %s2836_s6, %s2200_s1  ;;  %p2204_p11 = scmp.lt.u32.totalorder %s2200_s1, %s2836_s6 }
  0x39   :  { %p2206_p12 = pnand %p2204_p11, %p2201_p10 }
  0x3b   :  { %2209 = shalt.err (!%p2206_p12)
}
  0x3c   :  { %s2210_s13 = scalar_lea.vmem %s2434_s14, 256  ;;  %p2215_p0 = scmp.lt.s32.totalorder %s2434_s14, %s2434_s14 }
  0x3d   :  { %p2211_p13 = scmp.ne.s32.totalorder %s2434_s14, %s2210_s13  ;;  %p2216_p1 = scmp.lt.s32.totalorder %s2210_s13, %s2210_s13 }
  0x3f   :  { %p2217_p2 = por %p2216_p1, %p2215_p0 }
  0x41   :  { %p2218_p3 = pnand %p2217_p2, %p2211_p13 }
  0x43   :  { %2221 = shalt.err (!%p2218_p3)
}
  0x44   :  { %s2326_s0 = smov 128   ;;  %s2327_s30 = smov 8  }
  0x45   :  { %62 = dma.hbm_to_vmem [thread:$0]  %s2836_s6, 256, %s2434_s14, [#allocation6], %s2326_s0, %s2326_s0, %s2327_s30  }
  0x46   :  { %s2328_s17 = smov [#allocation10]   ;;  %s2222_s21 = scalar_lea.hbm %s2838_s8, 4096 }
  0x47   :  { %s80_s18 = sshll.u32 %s2328_s17, 4  ;;  %p2223_p4 = scmp.ne.s32.totalorder %s2838_s8, %s2222_s21  ;;  %s81_s18 = int_to_ptr.vmem [resolvable:$true] %s80_s18 }
  0x48   :  { %p2226_p5 = scmp.lt.u32.totalorder %s2222_s21, %s2838_s8 }
  0x4a   :  { %p2228_p6 = pnand %p2226_p5, %p2223_p4 }
  0x4c   :  { %2231 = shalt.err (!%p2228_p6)
}
  0x4d   :  { %s2232_s26 = scalar_lea.vmem %s81_s18, 4096  ;;  %p2237_p8 = scmp.lt.s32.totalorder %s81_s18, %s81_s18 }
  0x4e   :  { %p2233_p7 = scmp.ne.s32.totalorder %s81_s18, %s2232_s26  ;;  %p2238_p9 = scmp.lt.s32.totalorder %s2232_s26, %s2232_s26 }
  0x50   :  { %p2239_p10 = por %p2238_p9, %p2237_p8 }
  0x52   :  { %p2240_p11 = pnand %p2239_p10, %p2233_p7 }
  0x54   :  { %2243 = shalt.err (!%p2240_p11)
}
  0x55   :  { %86 = dma.hbm_to_vmem [thread:$0]  %s2838_s8, 4096, %s81_s18, [#allocation9], %s2326_s0, %s2326_s0, %s2327_s30  }
  0x56   :  { %2310 = dma.done.wait [#allocation3], 128  }
  0x57   :  { %2311 = vsyncadd [#allocation3], 4294967168 }
  0x58   :  { %2312 = dma.done.wait [#allocation6], 384  }
  0x59   :  { %2313 = vsyncadd [#allocation6], 4294966912 }
  0x5a   :  { %2314 = dma.done.wait [#allocation9], 10240  }
  0x5b   :  { %2315 = vsyncadd [#allocation9], 4294957056  ;;  %v2329_v0 = vmov 0.0|0.0   ;;  %vm2330_vm0 = vmmov 0   ;;  %v2331_v1 = vmov 0.0   ;;  %v107_v2 = vld [vmem:[%s2832_s2] sm:$0xff]  ;;  %v111_v9 = vlaneseq }
  0x5c   :  { %1950 = vmatprep.subr.bf16.mxu0 %v2329_v0  ;;  %1799 = vmatprep.mubr.msk.f32.mxu0 %vm2330_vm0, %v2331_v1  ;;  %v108_v3 = vld [vmem:[%s2832_s2 + $0x8] sm:$0xff]  ;;  %v109_v4 = vld [vmem:[%s2832_s2 + $0x10] sm:$0xff]  ;;  %v110_v6 = vld [vmem:[%s2832_s2 + $0x18] sm:$0xff]  ;;  %vm115_vm1 = vcmask 261120   ;;  %s2332_s30 = smov 96   ;;  %vm268_vm2 = vcmask 64512  }
  0x5d   :  { %1802 = vmatprep.subr.mxu1 %v2331_v1  ;;  %1804 = vmatprep.mubr.msk.f32.mxu1 %vm2330_vm0, %v2331_v1  ;;  %v1951_v5 = vpack.c.bf16 %v108_v3, %v107_v2  ;;  %v1954_v7 = vpack.c.bf16 %v110_v6, %v109_v4  ;;  %v2496_v8 = vld [vmem:[#allocation2] sm:$0xff]  ;;  %v2503_v10 = vshrl.u32 %v111_v9, 7  ;;  %v2508_v12 = vld [vmem:[#allocation7] sm:$0xff]  ;;  %v2518_v19 = vld [vmem:[#allocation5] sm:$0xff]  ;;  %s2333_s15 = smov 64   ;;  %vm556_vm3 = vcmask 523264  }
  0x5e   :  { %v356_v29 = vld [vmem:[%s2833_s3] sm:$0xff]  ;;  %v357_v30 = vld [vmem:[%s2833_s3 + $0x8] sm:$0xff]  ;;  %v358_v31 = vld [vmem:[%s2833_s3 + $0x10] sm:$0xff]  ;;  %vm1218_vm4 = vcmask 785408   ;;  %vm1223_vm5 = vcmask 1040384   ;;  %s2335_s14 = smov [#allocation11]  }
  0x5f   :  { %1952 = vmatpush3.bf16.msra.mxu0 %v1951_v5  ;;  %v2506_v11 = vsub.s32 0, %v2503_v10  ;;  %v1957_v32 = vpack.c.bf16 %v357_v30, %v356_v29  ;;  %v359_v33 = vld [vmem:[%s2833_s3 + $0x18] sm:$0xff]  ;;  %v2546_v41 = vsub.s32 1, %v2503_v10  ;;  %v462_v53 = vld [vmem:[%s2834_s4] sm:$0xff]  ;;  %v463_v54 = vld [vmem:[%s2834_s4 + $0x8] sm:$0xff]  ;;  %v2568_v62 = vsub.s32 2, %v2503_v10 }
  0x60   :  { %1953 = vmatprep.subr.bf16.mxu0 %v2329_v0  ;;  %v1960_v34 = vpack.c.bf16 %v359_v33, %v358_v31  ;;  %v1963_v55 = vpack.c.bf16 %v463_v54, %v462_v53  ;;  %v464_v56 = vld [vmem:[%s2834_s4 + $0x10] sm:$0xff]  ;;  %v465_v57 = vld [vmem:[%s2834_s4 + $0x18] sm:$0xff]  ;;  %v459_v63 = vsub.s32 3, %v2503_v10  ;;  %v544_v6 = vld [vmem:[%s2835_s5] sm:$0xff]  ;;  %v554_v30 = vsub.s32 5, %v2503_v10  ;;  %s1607_s8 = sshll.u32 %s2335_s14, 4  ;;  %s1608_s8 = int_to_ptr.vmem [resolvable:$true] %s1607_s8 }
  0x61   :  { %v114_v13 = vrot.slane %v2508_v12, %v2506_v11  ;;  %v363_v42 = vrot.slane %v2508_v12, %v2546_v41  ;;  %v1966_v58 = vpack.c.bf16 %v465_v57, %v464_v56  ;;  %v455_v2 = vrot.slane %v2508_v12, %v2568_v62  ;;  %s2244_s1 = scalar_lea.vmem %s1608_s8, 32  ;;  %p2249_p13 = scmp.lt.s32.totalorder %s1608_s8, %s1608_s8 }
  0x62   :  { %v460_v5 = vrot.slane %v2508_v12, %v459_v63  ;;  %v555_v31 = vrot.slane %v2508_v12, %v554_v30  ;;  %v651_v53 = vsub.s32 7, %v2503_v10  ;;  %p2245_p12 = scmp.ne.s32.totalorder %s1608_s8, %s2244_s1  ;;  %p2250_p0 = scmp.lt.s32.totalorder %s2244_s1, %s2244_s1 }
  0x63   :  { %1955 = vmatpush3.bf16.msra.mxu0 %v1954_v7  ;;  %v545_v7 = vld [vmem:[%s2835_s5 + $0x8] sm:$0xff] }
  0x64   :  { %1956 = vmatprep.subr.bf16.mxu0 %v2329_v0  ;;  %v1969_v9 = vpack.c.bf16 %v545_v7, %v544_v6  ;;  %v652_v57 = vrot.slane %v2508_v12, %v651_v53  ;;  %p2251_p1 = por %p2250_p0, %p2249_p13 }
  0x66   :  { %1800 = vmatmul.mubr.msk.f32.vlgmr.msra.gmra.mrb[0].mxu0 %vm115_vm1, %v2496_v8  ;;  %p2252_p2 = pnand %p2251_p1, %p2245_p12 }
  0x67   :  { %1820 = vmatprep.mubr.msk.f32.mxu0 %vm2330_vm0, %v2331_v1  ;;  %1958 = vmatpush3.bf16.msra.mxu0 %v1957_v32 }
  0x68   :  { %1959 = vmatprep.subr.bf16.mxu0 %v2329_v0 }
  0x6b   :  { %1961 = vmatpush3.bf16.msra.mxu0 %v1960_v34 }
  0x6c   :  { %1962 = vmatprep.subr.bf16.mxu0 %v2329_v0 }
 0x139   :  { %v185_v14 = vpop.f32.mrb[0].mxu0 }
 0x13a   :  { %v186_v15 = vadd.f32 %v185_v14, %v114_v13  ;;  %v1801_v16 = vpop.f32.mrb[1].mxu0  ;;  %v546_v14 = vld [vmem:[%s2835_s5 + $0x10] sm:$0xff] }
 0x13c   :  { %190 = vrot.lane.b32.xlu0 %v186_v15, %s2332_s30 }
 0x1ae   :  { %v191_v17 = vpop.permute.xlu0 %190 }
 0x1af   :  { %1803 = vmatpush3.xpose.msk.msra.mxu1 %vm115_vm1, %v191_v17  ;;  %v548_v17 = vld [vmem:[%s2835_s5 + $0x20] sm:$0xff] }
 0x1b0   :  { %1807 = vmatprep.subr.mxu1 %v2331_v1 }
 0x1b2   :  { %1805 = vmatmul.mubr.msk.f32.vlgmr.msra.gmra.mrb[0].mxu1 %vm115_vm1, %v186_v15 }
 0x1b3   :  { %1809 = vmatprep.mubr.msk.f32.mxu1 %vm2330_vm0, %v2331_v1 }
 0x285   :  { %v262_v18 = vpop.f32.mrb[0].mxu1 }
 0x286   :  { %v266_v20 = vmul.f32 0.17677669, %v262_v18  ;;  %v1806_v21 = vpop.f32.mrb[1].mxu1  ;;  %v549_v18 = vld [vmem:[%s2835_s5 + $0x28] sm:$0xff] }
 0x287   :  { %v550_v21 = vld [vmem:[%s2835_s5 + $0x30] sm:$0xff] }
 0x288   :  { %v267_v22 = vadd.f32 %v266_v20, %v2518_v19  ;;  %v1975_v20 = vpack.c.bf16 %v549_v18, %v548_v17  ;;  %v1660_v18 = vld [vmem:[%s2833_s3 + $0x20] sm:$0xff] }
 0x28a   :  { %v269_v23 = vsel %vm268_vm2, %v267_v22, -inf }
 0x28b   :  { %270 = vmax.xlane.f32.xlu0 %v269_v23 }
 0x318   :  { %v271_v24 = vpop.xlane.xlu0 %270 }
 0x319   :  { %v272_v25 = vsub.f32 %v267_v22, %v271_v24  ;;  %v551_v22 = vld [vmem:[%s2835_s5 + $0x38] sm:$0xff]  ;;  %v468_v24 = vsub.s32 4, %v2503_v10 }
 0x31a   :  { %v1978_v23 = vpack.c.bf16 %v551_v22, %v550_v21  ;;  %v1663_v22 = vld [vmem:[%s2833_s3 + $0x38] sm:$0xff] }
 0x31b   :  { %v273_v26 = vmul.f32 1.442695, %v272_v25  ;;  %v469_v25 = vrot.slane %v2508_v12, %v468_v24 }
 0x31d   :  { %2116 = vpow2.f32 %v273_v26 }
 0x327   :  { %v2117_v27 = vpop.eup %2116 }
 0x328   :  { %v275_v28 = vsel %vm268_vm2, %v2117_v27, 0.0 }
 0x329   :  { %276 = vadd.xlane.f32.xlu1 %v275_v28 }
 0x33a   :  { %280 = vrot.lane.b32.xlu1 %v186_v15, %s2333_s15  ;;  %v547_v15 = vld [vmem:[%s2835_s5 + $0x18] sm:$0xff] }
 0x33b   :  { %v1972_v16 = vpack.c.bf16 %v547_v15, %v546_v14 }
 0x3b6   :  { %v277_v35 = vpop.xlane.xlu1 %276 }
 0x3b7   :  { %2118 = vrcp.f32 %v277_v35 }
 0x3ba   :  { %v281_v36 = vpop.permute.xlu1 %280 }
 0x3bb   :  { %1808 = vmatpush3.msra.mxu1 %v281_v36 }
 0x3bc   :  { %1980 = vmatprep.subr.bf16.mxu1 %v2329_v0 }
 0x3c1   :  { %v2119_v37 = vpop.eup %2118 }
 0x3c2   :  { %v279_v38 = vmul.f32 %v2119_v37, %v2117_v27 }
 0x3c4   :  { %1810 = vmatmul.mubr.msk.f32.vlgmr.msra.gmra.mrb[2].mxu1 %vm268_vm2, %v279_v38 }
 0x3c5   :  { %1861 = vmatprep.mubr.msk.f32.mxu1 %vm2330_vm0, %v2331_v1 }
 0x497   :  { %v352_v39 = vpop.f32.mrb[2].mxu1 }
 0x498   :  { %v1811_v40 = vpop.f32.mrb[3].mxu1  ;;  %1821 = vmatmul.mubr.msk.f32.vlgmr.msra.gmra.mrb[2].mxu0 %vm115_vm1, %v352_v39 }
 0x499   :  { %1831 = vmatprep.mubr.msk.f32.mxu0 %vm2330_vm0, %v2331_v1  ;;  %1964 = vmatpush3.bf16.msra.mxu0 %v1963_v55 }
 0x49a   :  { %1965 = vmatprep.subr.bf16.mxu0 %v2329_v0 }
 0x49d   :  { %1967 = vmatpush3.bf16.msra.mxu0 %v1966_v58 }
 0x49e   :  { %1968 = vmatprep.subr.bf16.mxu0 %v2329_v0 }
 0x56b   :  { %v433_v43 = vpop.f32.mrb[2].mxu0 }
 0x56c   :  { %v434_v44 = vadd.f32 %v433_v43, %v363_v42  ;;  %v1822_v45 = vpop.f32.mrb[3].mxu0  ;;  %v1652_v43 = vld [vmem:[%s2832_s2 + $0x20] sm:$0xff] }
 0x56e   :  { %v437_v46 = vadd.f32 %v434_v44, %v2496_v8  ;;  %v1653_v44 = vld [vmem:[%s2832_s2 + $0x28] sm:$0xff] }
 0x56f   :  { %v1981_v45 = vpack.c.bf16 %v1653_v44, %v1652_v43  ;;  %v1665_v44 = vld [vmem:[%s2834_s4 + $0x20] sm:$0xff] }
 0x570   :  { %v438_v47 = vsel %vm115_vm1, %v437_v46, 0.0 }
 0x571   :  { %439 = vadd.xlane.f32.xlu1 %v438_v47  ;;  %1982 = vmatpush3.bf16.msra.mxu1 %v1981_v45  ;;  %v1655_v47 = vld [vmem:[%s2832_s2 + $0x38] sm:$0xff]  ;;  %v1666_v45 = vld [vmem:[%s2834_s4 + $0x28] sm:$0xff] }
 0x572   :  { %1983 = vmatprep.subr.bf16.mxu1 %v2329_v0 }
 0x5fe   :  { %v440_v48 = vpop.xlane.xlu1 %439 }
 0x5ff   :  { %v442_v49 = vmul.f32 0.03125, %v440_v48 }
 0x601   :  { %v443_v50 = vsub.f32 %v437_v46, %v442_v49  ;;  %v1654_v46 = vld [vmem:[%s2832_s2 + $0x30] sm:$0xff] }
 0x602   :  { %v1984_v48 = vpack.c.bf16 %v1655_v47, %v1654_v46  ;;  %v1993_v46 = vpack.c.bf16 %v1666_v45, %v1665_v44  ;;  %v1667_v47 = vld [vmem:[%s2834_s4 + $0x30] sm:$0xff]  ;;  %v1236_v44 = vld [vmem:[#allocation8 + $0x48] sm:$0xff]  ;;  %v1235_v45 = vld [vmem:[#allocation8 + $0x40] sm:$0xff] }
 0x603   :  { %v444_v51 = vmul.f32 %v443_v50, %v443_v50 }
 0x604   :  { %1985 = vmatpush3.bf16.msra.mxu1 %v1984_v48  ;;  %v1668_v48 = vld [vmem:[%s2834_s4 + $0x38] sm:$0xff] }
 0x605   :  { %v445_v52 = vsel %vm115_vm1, %v444_v51, 0.0  ;;  %1864 = vmatprep.subr.mxu1 %v2331_v1 }
 0x606   :  { %446 = vadd.xlane.f32.xlu0 %v445_v52  ;;  %v646_v52 = vsub.s32 6, %v2503_v10 }
 0x608   :  { %v647_v54 = vrot.slane %v2508_v12, %v646_v52 }
 0x693   :  { %v447_v59 = vpop.xlane.xlu0 %446 }
 0x694   :  { %v448_v60 = vmul.f32 0.03125, %v447_v59 }
 0x696   :  { %v449_v61 = vadd.f32 1e-05, %v448_v60  ;;  %v2645_v60 = vld [vmem:[#allocation7 + $0x8] sm:$0xff] }
 0x698   :  { %2120 = vrsqrt.f32 %v449_v61  ;;  %v664_v61 = vrot.slane %v2645_v60, %v2506_v11 }
 0x6a2   :  { %v2121_v3 = vpop.eup %2120 }
 0x6a3   :  { %v451_v4 = vmul.f32 %v2121_v3, %v443_v50 }
 0x6a5   :  { %v456_v8 = vmul.f32 %v455_v2, %v451_v4 }
 0x6a7   :  { %v461_v13 = vadd.f32 %v460_v5, %v456_v8 }
 0x6a9   :  { %1832 = vmatmul.mubr.msk.f32.vlgmr.msra.gmra.mrb[4].mxu0 %vm115_vm1, %v461_v13 }
 0x6aa   :  { %1970 = vmatpush3.bf16.msra.mxu0 %v1969_v9  ;;  %1850 = vmatprep.mubr.msk.f32.mxu0 %vm2330_vm0, %v2331_v1 }
 0x6ab   :  { %1971 = vmatprep.subr.bf16.mxu0 %v2329_v0 }
 0x6ae   :  { %1973 = vmatpush3.bf16.msra.mxu0 %v1972_v16 }
 0x6af   :  { %1974 = vmatprep.subr.bf16.mxu0 %v2329_v0 }
 0x6b2   :  { %1976 = vmatpush3.bf16.msra.mxu0 %v1975_v20  ;;  %v1662_v20 = vld [vmem:[%s2833_s3 + $0x30] sm:$0xff] }
 0x6b3   :  { %1977 = vmatprep.subr.bf16.mxu0 %v2329_v0 }
 0x6b6   :  { %1979 = vmatpush3.bf16.msra.mxu0 %v1978_v23  ;;  %v1990_v23 = vpack.c.bf16 %v1663_v22, %v1662_v20  ;;  %v1105_v20 = vrot.slane %v2645_v60, %v554_v30  ;;  %v1227_v30 = vld [vmem:[#allocation8] sm:$0xff] }
 0x6b7   :  { %1986 = vmatprep.subr.bf16.mxu0 %v2329_v0 }
 0x77c   :  { %v539_v26 = vpop.f32.mrb[4].mxu0 }
 0x77d   :  { %v540_v27 = vadd.f32 %v539_v26, %v469_v25  ;;  %v1833_v28 = vpop.f32.mrb[5].mxu0 }
 0x77f   :  { %v543_v29 = vmax.f32 %v540_v27, 0.0 }
 0x781   :  { %1851 = vmatmul.mubr.msk.f32.vlgmr.msra.gmra.mrb[6].mxu0 %vm556_vm3, %v543_v29 }
 0x782   :  { %1882 = vmatprep.mubr.msk.f32.mxu0 %vm2330_vm0, %v2331_v1 }
 0x854   :  { %v626_v32 = vpop.f32.mrb[6].mxu0 }
 0x855   :  { %v627_v33 = vadd.f32 %v626_v32, %v555_v31  ;;  %v1852_v34 = vpop.f32.mrb[7].mxu0  ;;  %v912_v32 = vrot.slane %v2645_v60, %v2546_v41 }
 0x857   :  { %v630_v35 = vadd.f32 %v627_v33, %v461_v13 }
 0x859   :  { %v631_v36 = vsel %vm115_vm1, %v630_v35, 0.0 }
 0x85a   :  { %632 = vadd.xlane.f32.xlu0 %v631_v36 }
 0x8e7   :  { %v633_v37 = vpop.xlane.xlu0 %632 }
 0x8e8   :  { %v634_v38 = vmul.f32 0.03125, %v633_v37 }
 0x8ea   :  { %v635_v39 = vsub.f32 %v630_v35, %v634_v38 }
 0x8ec   :  { %v636_v40 = vmul.f32 %v635_v39, %v635_v39 }
 0x8ee   :  { %v637_v42 = vsel %vm115_vm1, %v636_v40, 0.0 }
 0x8ef   :  { %638 = vadd.xlane.f32.xlu0 %v637_v42 }
 0x97c   :  { %v639_v49 = vpop.xlane.xlu0 %638 }
 0x97d   :  { %v640_v50 = vmul.f32 0.03125, %v639_v49  ;;  %v1996_v49 = vpack.c.bf16 %v1668_v48, %v1667_v47 }
 0x97f   :  { %v641_v51 = vadd.f32 1e-05, %v640_v50  ;;  %v1670_v50 = vld [vmem:[%s2835_s5 + $0x40] sm:$0xff] }
 0x981   :  { %2122 = vrsqrt.f32 %v641_v51  ;;  %v1671_v51 = vld [vmem:[%s2835_s5 + $0x48] sm:$0xff] }
 0x98b   :  { %v2123_v55 = vpop.eup %2122 }
 0x98c   :  { %v643_v56 = vmul.f32 %v2123_v55, %v635_v39  ;;  %v1999_v55 = vpack.c.bf16 %v1671_v51, %v1670_v50  ;;  %v1243_v50 = vld [vmem:[#allocation8 + $0x80] sm:$0xff] }
 0x98d   :  { %v1239_v51 = vld [vmem:[#allocation8 + $0x60] sm:$0xff] }
 0x98e   :  { %v648_v58 = vmul.f32 %v647_v54, %v643_v56  ;;  %v1672_v54 = vld [vmem:[%s2835_s5 + $0x50] sm:$0xff]  ;;  %v1673_v56 = vld [vmem:[%s2835_s5 + $0x58] sm:$0xff] }
 0x990   :  { %v653_v59 = vadd.f32 %v652_v57, %v648_v58  ;;  %v2002_v57 = vpack.c.bf16 %v1673_v56, %v1672_v54  ;;  %v1674_v58 = vld [vmem:[%s2835_s5 + $0x60] sm:$0xff]  ;;  %v1241_v56 = vld [vmem:[#allocation8 + $0x70] sm:$0xff] }
 0x992   :  { %1862 = vmatmul.mubr.msk.f32.vlgmr.msra.gmra.mrb[4].mxu1 %vm115_vm1, %v653_v59 }
 0x993   :  { %1866 = vmatprep.mubr.msk.f32.mxu1 %vm2330_vm0, %v2331_v1 }
 0xa65   :  { %v734_v2 = vpop.f32.mrb[4].mxu1 }
 0xa66   :  { %v735_v3 = vadd.f32 %v734_v2, %v664_v61  ;;  %v1863_v4 = vpop.f32.mrb[5].mxu1 }
 0xa68   :  { %739 = vrot.lane.b32.xlu0 %v735_v3, %s2332_s30 }
 0xada   :  { %v740_v5 = vpop.permute.xlu0 %739 }
 0xadb   :  { %1865 = vmatpush3.xpose.msk.msra.mxu1 %vm115_vm1, %v740_v5  ;;  %v1003_v5 = vrot.slane %v2645_v60, %v2568_v62 }
 0xadc   :  { %1869 = vmatprep.subr.mxu1 %v2331_v1 }
 0xade   :  { %1867 = vmatmul.mubr.msk.f32.vlgmr.msra.gmra.mrb[6].mxu1 %vm115_vm1, %v735_v3 }
 0xadf   :  { %1871 = vmatprep.mubr.msk.f32.mxu1 %vm2330_vm0, %v2331_v1 }
 0xbb1   :  { %v811_v12 = vpop.f32.mrb[6].mxu1 }
 0xbb2   :  { %v815_v6 = vmul.f32 0.17677669, %v811_v12  ;;  %v1868_v7 = vpop.f32.mrb[7].mxu1 }
 0xbb3   :  { %v1008_v7 = vrot.slane %v2645_v60, %v459_v63  ;;  %v1018_v63 = vrot.slane %v2645_v60, %v468_v24 }
 0xbb4   :  { %v816_v8 = vadd.f32 %v815_v6, %v2518_v19  ;;  %v1661_v19 = vld [vmem:[%s2833_s3 + $0x28] sm:$0xff] }
 0xbb5   :  { %v1987_v21 = vpack.c.bf16 %v1661_v19, %v1660_v18 }
 0xbb6   :  { %v817_v9 = vsel %vm268_vm2, %v816_v8, -inf }
 0xbb7   :  { %818 = vmax.xlane.f32.xlu1 %v817_v9  ;;  %1988 = vmatpush3.bf16.msra.mxu0 %v1987_v21 }
 0xbb8   :  { %1989 = vmatprep.subr.bf16.mxu0 %v2329_v0 }
 0xbbb   :  { %1991 = vmatpush3.bf16.msra.mxu0 %v1990_v23 }
 0xbbc   :  { %1998 = vmatprep.subr.bf16.mxu0 %v2329_v0 }
 0xc44   :  { %v819_v13 = vpop.xlane.xlu1 %818 }
 0xc45   :  { %v820_v14 = vsub.f32 %v816_v8, %v819_v13  ;;  %v1676_v13 = vld [vmem:[%s2835_s5 + $0x70] sm:$0xff] }
 0xc47   :  { %v821_v15 = vmul.f32 1.442695, %v820_v14  ;;  %v1677_v14 = vld [vmem:[%s2835_s5 + $0x78] sm:$0xff] }
 0xc49   :  { %2124 = vpow2.f32 %v821_v15  ;;  %v2008_v15 = vpack.c.bf16 %v1677_v14, %v1676_v13  ;;  %v1251_v14 = vld [vmem:[#allocation8 + $0xc0] sm:$0xff] }
 0xc53   :  { %v2125_v16 = vpop.eup %2124 }
 0xc54   :  { %v823_v17 = vsel %vm268_vm2, %v2125_v16, 0.0 }
 0xc55   :  { %824 = vadd.xlane.f32.xlu1 %v823_v17 }
 0xc66   :  { %828 = vrot.lane.b32.xlu1 %v735_v3, %s2333_s15 }
 0xce2   :  { %v825_v25 = vpop.xlane.xlu1 %824 }
 0xce3   :  { %2126 = vrcp.f32 %v825_v25 }
 0xce6   :  { %v829_v26 = vpop.permute.xlu1 %828 }
 0xce7   :  { %1870 = vmatpush3.msra.mxu1 %v829_v26 }
 0xce8   :  { %1992 = vmatprep.subr.bf16.mxu1 %v2329_v0 }
 0xced   :  { %v2127_v27 = vpop.eup %2126 }
 0xcee   :  { %v827_v28 = vmul.f32 %v2127_v27, %v2125_v16 }
 0xcf0   :  { %1872 = vmatmul.mubr.msk.f32.vlgmr.msra.gmra.mrb[8].mxu1 %vm268_vm2, %v827_v28 }
 0xcf1   :  { %1893 = vmatprep.mubr.msk.f32.mxu1 %vm2330_vm0, %v2331_v1  ;;  %1994 = vmatpush3.bf16.msra.mxu1 %v1993_v46  ;;  %v1238_v46 = vld [vmem:[#allocation8 + $0x58] sm:$0xff] }
 0xcf2   :  { %1995 = vmatprep.subr.bf16.mxu1 %v2329_v0  ;;  %v2046_v48 = vpack.c.bf16 %v1238_v46, %v1235_v45  ;;  %v1269_v45 = vld [vmem:[#allocation8 + $0x150] sm:$0xff]  ;;  %v1272_v46 = vld [vmem:[#allocation8 + $0x168] sm:$0xff] }
 0xcf5   :  { %1997 = vmatpush3.bf16.msra.mxu1 %v1996_v49  ;;  %v1240_v49 = vld [vmem:[#allocation8 + $0x68] sm:$0xff] }
 0xcf6   :  { %v2018_v54 = vpack.c.bf16 %v1243_v50, %v1240_v49  ;;  %v2040_v49 = vpack.c.bf16 %v1272_v46, %v1269_v45  ;;  %v1274_v50 = vld [vmem:[#allocation8 + $0x178] sm:$0xff]  ;;  %v1510_v46 = vld [vmem:[#allocation10 + $0x60] sm:$0xff] }
 0xdc3   :  { %v900_v29 = vpop.f32.mrb[8].mxu1 }
 0xdc4   :  { %v1873_v31 = vpop.f32.mrb[9].mxu1  ;;  %1883 = vmatmul.mubr.msk.f32.vlgmr.msra.gmra.mrb[8].mxu0 %vm115_vm1, %v900_v29 }
 0xdc5   :  { %1912 = vmatprep.mubr.msk.f32.mxu0 %vm2330_vm0, %v2331_v1  ;;  %2000 = vmatpush3.bf16.msra.mxu0 %v1999_v55  ;;  %v1228_v31 = vld [vmem:[#allocation8 + $0x8] sm:$0xff]  ;;  %v1242_v55 = vld [vmem:[#allocation8 + $0x78] sm:$0xff] }
 0xdc6   :  { %2001 = vmatprep.subr.bf16.mxu0 %v2329_v0 }
 0xdc9   :  { %2003 = vmatpush3.bf16.msra.mxu0 %v2002_v57  ;;  %v1244_v57 = vld [vmem:[#allocation8 + $0x88] sm:$0xff] }
 0xdca   :  { %2004 = vmatprep.subr.bf16.mxu0 %v2329_v0 }
 0xe97   :  { %v982_v33 = vpop.f32.mrb[8].mxu0 }
 0xe98   :  { %v983_v34 = vadd.f32 %v982_v33, %v912_v32  ;;  %v1884_v35 = vpop.f32.mrb[9].mxu0  ;;  %v1231_v32 = vld [vmem:[#allocation8 + $0x20] sm:$0xff] }
 0xe99   :  { %v2010_v33 = vpack.c.bf16 %v1231_v32, %v1228_v31  ;;  %v1229_v35 = vld [vmem:[#allocation8 + $0x10] sm:$0xff] }
 0xe9a   :  { %v986_v36 = vadd.f32 %v983_v34, %v653_v59  ;;  %v1675_v59 = vld [vmem:[%s2835_s5 + $0x68] sm:$0xff]  ;;  %v1230_v34 = vld [vmem:[#allocation8 + $0x18] sm:$0xff]  ;;  %s2334_s5 = smov 32  }
 0xe9b   :  { %v2005_v61 = vpack.c.bf16 %v1675_v59, %v1674_v58  ;;  %2011 = vmatprep.subr.bf16.mxu1 %v2010_v33  ;;  %v1246_v58 = vld [vmem:[#allocation8 + $0x98] sm:$0xff]  ;;  %v1249_v59 = vld [vmem:[#allocation8 + $0xb0] sm:$0xff]  ;;  %v1267_v33 = vld [vmem:[#allocation8 + $0x140] sm:$0xff] }
 0xe9c   :  { %v987_v37 = vsel %vm115_vm1, %v986_v36, 0.0 }
 0xe9d   :  { %988 = vadd.xlane.f32.xlu0 %v987_v37  ;;  %2006 = vmatpush3.bf16.msra.mxu0 %v2005_v61  ;;  %v2012_v37 = vpack.c.bf16 %v1230_v34, %v1227_v30  ;;  %v2020_v61 = vpack.c.bf16 %v1242_v55, %v1239_v51  ;;  %v1264_v30 = vld [vmem:[#allocation8 + $0x128] sm:$0xff] }
 0xe9e   :  { %2007 = vmatprep.subr.bf16.mxu0 %v2329_v0  ;;  %v2034_v34 = vpack.c.bf16 %v1267_v33, %v1264_v30  ;;  %v1506_v33 = vld [vmem:[#allocation10 + $0x40] sm:$0xff] }
 0xea1   :  { %2009 = vmatpush3.bf16.msra.mxu0 %v2008_v15 }
 0xea2   :  { %2042 = vmatprep.subr.bf16.mxu0 %v2329_v0 }
 0xf2a   :  { %v989_v38 = vpop.xlane.xlu0 %988 }
 0xf2b   :  { %v990_v39 = vmul.f32 0.03125, %v989_v38 }
 0xf2d   :  { %v991_v40 = vsub.f32 %v986_v36, %v990_v39  ;;  %v1232_v36 = vld [vmem:[#allocation8 + $0x28] sm:$0xff]  ;;  %v1234_v39 = vld [vmem:[#allocation8 + $0x38] sm:$0xff] }
 0xf2e   :  { %v2043_v38 = vpack.c.bf16 %v1232_v36, %v1229_v35  ;;  %v1263_v35 = vld [vmem:[#allocation8 + $0x120] sm:$0xff]  ;;  %v1266_v36 = vld [vmem:[#allocation8 + $0x138] sm:$0xff] }
 0xf2f   :  { %v992_v42 = vmul.f32 %v991_v40, %v991_v40 }
 0xf31   :  { %v993_v43 = vsel %vm115_vm1, %v992_v42, 0.0  ;;  %v1233_v42 = vld [vmem:[#allocation8 + $0x30] sm:$0xff] }
 0xf32   :  { %994 = vadd.xlane.f32.xlu1 %v993_v43  ;;  %v2016_v47 = vpack.c.bf16 %v1236_v44, %v1233_v42  ;;  %v1270_v42 = vld [vmem:[#allocation8 + $0x158] sm:$0xff] }
 0xfbf   :  { %v995_v2 = vpop.xlane.xlu1 %994 }
 0xfc0   :  { %v996_v3 = vmul.f32 0.03125, %v995_v2  ;;  %v2049_v2 = vpack.c.bf16 %v1244_v57, %v1241_v56  ;;  %v1201_v56 = vrot.slane %v2645_v60, %v651_v53 }
 0xfc2   :  { %v997_v4 = vadd.f32 1e-05, %v996_v3  ;;  %v1245_v3 = vld [vmem:[#allocation8 + $0x90] sm:$0xff] }
 0xfc4   :  { %2128 = vrsqrt.f32 %v997_v4  ;;  %v2022_v4 = vpack.c.bf16 %v1249_v59, %v1246_v58  ;;  %v1514_v58 = vld [vmem:[#allocation10 + $0x80] sm:$0xff]  ;;  %v1515_v59 = vld [vmem:[#allocation10 + $0x88] sm:$0xff] }
 0xfce   :  { %v2129_v12 = vpop.eup %2128 }
 0xfcf   :  { %v999_v6 = vmul.f32 %v2129_v12, %v991_v40  ;;  %v1237_v40 = vld [vmem:[#allocation8 + $0x50] sm:$0xff]  ;;  %v1247_v12 = vld [vmem:[#allocation8 + $0xa0] sm:$0xff] }
 0xfd0   :  { %v2014_v43 = vpack.c.bf16 %v1237_v40, %v1234_v39  ;;  %v1268_v39 = vld [vmem:[#allocation8 + $0x148] sm:$0xff] }
 0xfd1   :  { %v1004_v8 = vmul.f32 %v1003_v5, %v999_v6  ;;  %v1248_v5 = vld [vmem:[#allocation8 + $0xa8] sm:$0xff]  ;;  %v1250_v6 = vld [vmem:[#allocation8 + $0xb8] sm:$0xff] }
 0xfd2   :  { %v2052_v13 = vpack.c.bf16 %v1250_v6, %v1247_v12  ;;  %v1516_v6 = vld [vmem:[#allocation10 + $0x90] sm:$0xff] }
 0xfd3   :  { %v1009_v9 = vadd.f32 %v1008_v7, %v1004_v8  ;;  %v1252_v7 = vld [vmem:[#allocation8 + $0xc8] sm:$0xff]  ;;  %v1255_v8 = vld [vmem:[#allocation8 + $0xe0] sm:$0xff] }
 0xfd4   :  { %v2026_v15 = vpack.c.bf16 %v1255_v8, %v1252_v7  ;;  %v1517_v7 = vld [vmem:[#allocation10 + $0x98] sm:$0xff] }
 0xfd5   :  { %1894 = vmatmul.mubr.msk.f32.vlgmr.msra.gmra.mrb[10].mxu1 %vm115_vm1, %v1009_v9 }
 0xfd6   :  { %1355 = vmatprep.mubr.f32.mxu1 %v2331_v1  ;;  %2013 = vmatpush1.bf16.msra.mxu1 %v2012_v37  ;;  %v1265_v37 = vld [vmem:[#allocation8 + $0x130] sm:$0xff] }
 0xfd7   :  { %2015 = vmatprep.subr.bf16.mxu1 %v2014_v43  ;;  %v2061_v40 = vpack.c.bf16 %v1268_v39, %v1265_v37  ;;  %v1273_v43 = vld [vmem:[#allocation8 + $0x170] sm:$0xff]  ;;  %v1525_v37 = vld [vmem:[#allocation10 + $0xd8] sm:$0xff] }
 0xfd8   :  { %v2038_v44 = vpack.c.bf16 %v1273_v43, %v1270_v42  ;;  %v1508_v39 = vld [vmem:[#allocation10 + $0x50] sm:$0xff]  ;;  %v1526_v43 = vld [vmem:[#allocation10 + $0xe0] sm:$0xff] }
 0xfda   :  { %2017 = vmatpush1.bf16.msra.mxu1 %v2016_v47  ;;  %v1271_v47 = vld [vmem:[#allocation8 + $0x160] sm:$0xff] }
 0xfdb   :  { %2019 = vmatprep.subr.bf16.mxu1 %v2018_v54  ;;  %v2064_v54 = vpack.c.bf16 %v1274_v50, %v1271_v47  ;;  %v1511_v47 = vld [vmem:[#allocation10 + $0x68] sm:$0xff]  ;;  %v1529_v50 = vld [vmem:[#allocation10 + $0xf8] sm:$0xff] }
 0xfde   :  { %2021 = vmatpush1.bf16.msra.mxu1 %v2020_v61 }
 0xfdf   :  { %2023 = vmatprep.subr.bf16.mxu1 %v2022_v4  ;;  %v1499_v4 = vld [vmem:[#allocation10 + $0x8] sm:$0xff] }
0x10a8   :  { %v1088_v16 = vpop.f32.mrb[10].mxu1 }
0x10a9   :  { %v1089_v17 = vadd.f32 %v1088_v16, %v1018_v63  ;;  %v1895_v18 = vpop.f32.mrb[11].mxu1  ;;  %v1254_v63 = vld [vmem:[#allocation8 + $0xd8] sm:$0xff]  ;;  %v1253_v16 = vld [vmem:[#allocation8 + $0xd0] sm:$0xff] }
0x10aa   :  { %v1258_v18 = vld [vmem:[#allocation8 + $0xf8] sm:$0xff] }
0x10ab   :  { %v1092_v19 = vmax.f32 %v1089_v17, 0.0  ;;  %v1256_v17 = vld [vmem:[#allocation8 + $0xe8] sm:$0xff] }
0x10ad   :  { %1913 = vmatmul.mubr.msk.f32.vlgmr.msra.gmra.mrb[10].mxu0 %vm556_vm3, %v1092_v19  ;;  %v1261_v19 = vld [vmem:[#allocation8 + $0x110] sm:$0xff] }
0x10ae   :  { %1947 = vmatprep.mubr.msk.f32.mxu0 %vm2330_vm0, %v2331_v1  ;;  %2044 = vmatpush3.bf16.msra.mxu0 %v2043_v38  ;;  %v2036_v38 = vpack.c.bf16 %v1266_v36, %v1263_v35  ;;  %v1524_v36 = vld [vmem:[#allocation10 + $0xd0] sm:$0xff] }
0x10af   :  { %2045 = vmatprep.subr.bf16.mxu0 %v2329_v0 }
0x10b2   :  { %2047 = vmatpush3.bf16.msra.mxu0 %v2046_v48  ;;  %v1196_v48 = vrot.slane %v2645_v60, %v646_v52  ;;  %v2066_v52 = vpack.c.bf16 %v1515_v59, %v1514_v58  ;;  %v1498_v60 = vld [vmem:[#allocation10] sm:$0xff] }
0x10b3   :  { %2048 = vmatprep.subr.bf16.mxu0 %v2329_v0  ;;  %v1226_v59 = vld [vmem:[%s2839_s9] ss:$8 sm:$0x7] }
0x10b6   :  { %2050 = vmatpush3.bf16.msra.mxu0 %v2049_v2 }
0x10b7   :  { %2051 = vmatprep.subr.bf16.mxu0 %v2329_v0 }
0x10ba   :  { %2053 = vmatpush3.bf16.msra.mxu0 %v2052_v13  ;;  %v2068_v13 = vpack.c.bf16 %v1499_v4, %v1498_v60 }
0x10bb   :  { %2054 = vmatprep.subr.bf16.mxu0 %v2329_v0 }
0x1180   :  { %v1175_v21 = vpop.f32.mrb[10].mxu0 }
0x1181   :  { %v1176_v22 = vadd.f32 %v1175_v21, %v1105_v20  ;;  %v1914_v23 = vpop.f32.mrb[11].mxu0  ;;  %v2028_v20 = vpack.c.bf16 %v1254_v63, %v1251_v14  ;;  %v2055_v21 = vpack.c.bf16 %v1256_v17, %v1253_v16  ;;  %v2070_v14 = vpack.c.bf16 %v1517_v7, %v1516_v6  ;;  %v1501_v63 = vld [vmem:[#allocation10 + $0x18] sm:$0xff]  ;;  %v1518_v17 = vld [vmem:[#allocation10 + $0xa0] sm:$0xff] }
0x1182   :  { %v2030_v23 = vpack.c.bf16 %v1261_v19, %v1258_v18  ;;  %v1519_v18 = vld [vmem:[#allocation10 + $0xa8] sm:$0xff] }
0x1183   :  { %v1179_v25 = vadd.f32 %v1176_v22, %v1009_v9  ;;  %v2024_v9 = vpack.c.bf16 %v1248_v5, %v1245_v3  ;;  %v1257_v22 = vld [vmem:[#allocation8 + $0xf0] sm:$0xff]  ;;  %2056 = vmatpush3.bf16.msra.mxu0 %v2055_v21  ;;  %v1502_v21 = vld [vmem:[#allocation10 + $0x20] sm:$0xff] }
0x1184   :  { %2057 = vmatprep.subr.bf16.mxu0 %v2329_v0 }
0x1185   :  { %v1180_v26 = vsel %vm115_vm1, %v1179_v25, 0.0  ;;  %2025 = vmatpush1.bf16.msra.mxu1 %v2024_v9 }
0x1186   :  { %1181 = vadd.xlane.f32.xlu0 %v1180_v26  ;;  %2027 = vmatprep.subr.bf16.mxu1 %v2026_v15  ;;  %v1259_v26 = vld [vmem:[#allocation8 + $0x100] sm:$0xff]  ;;  %v1500_v15 = vld [vmem:[#allocation10 + $0x10] sm:$0xff] }
0x1187   :  { %v2072_v19 = vpack.c.bf16 %v1501_v63, %v1500_v15 }
0x1189   :  { %2029 = vmatpush1.bf16.msra.mxu1 %v2028_v20  ;;  %v2074_v20 = vpack.c.bf16 %v1519_v18, %v1518_v17 }
0x118a   :  { %2031 = vmatprep.subr.bf16.mxu1 %v2030_v23  ;;  %v1520_v23 = vld [vmem:[#allocation10 + $0xb0] sm:$0xff] }
0x1213   :  { %v1182_v24 = vpop.xlane.xlu0 %1181 }
0x1214   :  { %v1183_v27 = vmul.f32 0.03125, %v1182_v24  ;;  %v1262_v24 = vld [vmem:[#allocation8 + $0x118] sm:$0xff] }
0x1216   :  { %v2742_v28 = vsub.f32 %v1179_v25, %v1183_v27  ;;  %v1260_v25 = vld [vmem:[#allocation8 + $0x108] sm:$0xff] }
0x1217   :  { %v2032_v27 = vpack.c.bf16 %v1260_v25, %v1257_v22  ;;  %v1503_v22 = vld [vmem:[#allocation10 + $0x28] sm:$0xff]  ;;  %v1521_v25 = vld [vmem:[#allocation10 + $0xb8] sm:$0xff] }
0x1218   :  { %v1185_v29 = vmul.f32 %v2742_v28, %v2742_v28 }
0x1219   :  { %2033 = vmatpush1.bf16.msra.mxu1 %v2032_v27  ;;  %v1504_v27 = vld [vmem:[#allocation10 + $0x30] sm:$0xff] }
0x121a   :  { %v1186_v1 = vsel %vm115_vm1, %v1185_v29, 0.0  ;;  %v2058_v29 = vpack.c.bf16 %v1262_v24, %v1259_v26  ;;  %2035 = vmatprep.subr.bf16.mxu1 %v2034_v34  ;;  %v2076_v26 = vpack.c.bf16 %v1503_v22, %v1502_v21  ;;  %v2078_v24 = vpack.c.bf16 %v1521_v25, %v1520_v23  ;;  %v1507_v34 = vld [vmem:[#allocation10 + $0x48] sm:$0xff] }
0x121b   :  { %1187 = vadd.xlane.f32.xlu0 %v1186_v1  ;;  %v2084_v35 = vpack.c.bf16 %v1507_v34, %v1506_v33 }
0x121c   :  { %2059 = vmatpush3.bf16.msra.mxu0 %v2058_v29  ;;  %v1505_v29 = vld [vmem:[#allocation10 + $0x38] sm:$0xff] }
0x121d   :  { %2060 = vmatprep.subr.bf16.mxu0 %v2329_v0  ;;  %2037 = vmatpush1.bf16.msra.mxu1 %v2036_v38  ;;  %v2086_v38 = vpack.c.bf16 %v1525_v37, %v1524_v36 }
0x121e   :  { %2039 = vmatprep.subr.bf16.mxu1 %v2038_v44  ;;  %v1527_v44 = vld [vmem:[#allocation10 + $0xe8] sm:$0xff] }
0x121f   :  { %v2090_v45 = vpack.c.bf16 %v1527_v44, %v1526_v43 }
0x1220   :  { %2062 = vmatpush3.bf16.msra.mxu0 %v2061_v40  ;;  %v1509_v40 = vld [vmem:[#allocation10 + $0x58] sm:$0xff] }
0x1221   :  { %2063 = vmatprep.subr.bf16.mxu0 %v2329_v0  ;;  %2041 = vmatpush1.bf16.msra.mxu1 %v2040_v49  ;;  %v2088_v42 = vpack.c.bf16 %v1509_v40, %v1508_v39  ;;  %v1528_v49 = vld [vmem:[#allocation10 + $0xf0] sm:$0xff] }
0x1222   :  { %2067 = vmatprep.subr.bf16.mxu1 %v2066_v52  ;;  %v1279_v52 = vrot.slane %v1226_v59, %v2506_v11 }
0x1224   :  { %2065 = vmatpush3.bf16.msra.mxu0 %v2064_v54  ;;  %v2094_v54 = vpack.c.bf16 %v1529_v50, %v1528_v49 }
0x12a8   :  { %v1188_v1 = vpop.xlane.xlu0 %1187 }
0x12a9   :  { %v1189_v31 = vmul.f32 0.03125, %v1188_v1  ;;  %v1522_v1 = vld [vmem:[#allocation10 + $0xc0] sm:$0xff] }
0x12ab   :  { %v1190_v32 = vadd.f32 1e-05, %v1189_v31  ;;  %v1523_v31 = vld [vmem:[#allocation10 + $0xc8] sm:$0xff] }
0x12ac   :  { %v2082_v30 = vpack.c.bf16 %v1523_v31, %v1522_v1 }
0x12ad   :  { %2130 = vrsqrt.f32 %v1190_v32  ;;  %v2080_v32 = vpack.c.bf16 %v1505_v29, %v1504_v27 }
0x12b7   :  { %v2131_v51 = vpop.eup %2130 }
0x12b8   :  { %v1192_v55 = vmul.f32 %v2131_v51, %v2742_v28  ;;  %v1512_v51 = vld [vmem:[#allocation10 + $0x70] sm:$0xff] }
0x12ba   :  { %v1197_v57 = vmul.f32 %v1196_v48, %v1192_v55  ;;  %v2092_v48 = vpack.c.bf16 %v1511_v47, %v1510_v46  ;;  %v1513_v55 = vld [vmem:[#allocation10 + $0x78] sm:$0xff] }
0x12bc   :  { %v1202_v61 = vadd.f32 %v1201_v56, %v1197_v57  ;;  %v2096_v56 = vpack.c.bf16 %v1513_v55, %v1512_v51  ;;  %v1682_v57 = vld [vmem:[%s2839_s9 + $0x4] ss:$8 sm:$0x3] }
0x12bd   :  { %v1455_v58 = vadd.f32 1e-05, %v1682_v57 }
0x12be   :  { %v1208_v2 = vrot.slane %v1202_v61, 2  ;;  %v1204_v0 = vrot.slane %v1202_v61, 1  ;;  %v1212_v3 = vrot.slane %v1202_v61, 3 }
0x12bf   :  { %2132 = vrsqrt.f32 %v1455_v58 }
0x12c0   :  { %1209 = vrot.lane.b32.xlu1 %v1208_v2, %s2333_s15  ;;  %1205 = vrot.lane.b32.xlu0 %v1204_v0, %s2334_s5  ;;  %v1287_v2 = vrot.slane %v1226_v59, %v2568_v62 }
0x12c4   :  { %1213 = vrot.lane.b32.xlu0 %v1212_v3, %s2332_s30  ;;  %v1283_v3 = vrot.slane %v1226_v59, %v2546_v41 }
0x12c9   :  { %v2133_v0 = vpop.eup %2132 }
0x1332   :  { %v1206_v10 = vpop.permute.xlu0 %1205  ;;  %v1210_v28 = vpop.permute.xlu1 %1209 }
0x1333   :  { %v1216_v53 = vsel %vm115_vm1, %v1202_v61, %v1206_v10  ;;  %v1681_v61 = vld [vmem:[%s2839_s9 + $0x3] ss:$8 sm:$0x3] }
0x1334   :  { %v1217_v5 = vsel %vm556_vm3, %v1216_v53, %v1210_v28  ;;  %v1446_v10 = vrot.slane %v1681_v61, %v2506_v11  ;;  %v1679_v53 = vld [vmem:[%s2839_s9 + $0x1] ss:$8 sm:$0x3]  ;;  %v1450_v4 = vrot.slane %v1681_v61, %v2546_v41 }
0x1335   :  { %v1474_v15 = vrot.slane %v1679_v53, %v2506_v11 }
0x1336   :  { %v1214_v12 = vpop.permute.xlu0 %1213 }
0x1337   :  { %v1219_v8 = vsel %vm1218_vm4, %v1217_v5, %v1214_v12  ;;  %v1461_v12 = vrot.slane %v2133_v0, %v2506_v11 }
0x1338   :  { %v1221_v9 = vrot.slane %v1219_v8, 3 }
0x133a   :  { %v1224_v16 = vsel %vm1223_vm5, %v1219_v8, %v1221_v9  ;;  %v1465_v9 = vrot.slane %v2133_v0, %v2546_v41 }
0x133b   :  { %1356 = vmatmul.mubr.f32.vlgmr.msra.gmra.mrb[12].mxu1 %v1224_v16  ;;  %1225 = vst [vmem:[#allocation11] sm:$0x3] %v1224_v16  ;;  %1948 = vmatmul.mubr.f32.vlgmr.msra.gmra.mrb[12].mxu0 %v1224_v16  ;;  %v1478_v16 = vrot.slane %v1679_v53, %v2546_v41 }
0x133c   :  { %2069 = vmatpush3.bf16.msra.mxu1 %v2068_v13  ;;  %v1680_v13 = vld [vmem:[%s2839_s9 + $0x2] ss:$8 sm:$0x3] }
0x133d   :  { %2071 = vmatprep.subr.bf16.mxu1 %v2070_v14  ;;  %v1487_v18 = vrot.slane %v1680_v13, %v2506_v11 }
0x1340   :  { %2073 = vmatpush3.bf16.msra.mxu1 %v2072_v19 }
0x1341   :  { %2075 = vmatprep.subr.bf16.mxu1 %v2074_v20  ;;  %v1491_v20 = vrot.slane %v1680_v13, %v2546_v41 }
0x1344   :  { %2077 = vmatpush3.bf16.msra.mxu1 %v2076_v26 }
0x1345   :  { %2079 = vmatprep.subr.bf16.mxu1 %v2078_v24 }
0x1348   :  { %2081 = vmatpush3.bf16.msra.mxu1 %v2080_v32 }
0x1349   :  { %2083 = vmatprep.subr.bf16.mxu1 %v2082_v30 }
0x134c   :  { %2085 = vmatpush3.bf16.msra.mxu1 %v2084_v35 }
0x134d   :  { %2087 = vmatprep.subr.bf16.mxu1 %v2086_v38 }
0x1350   :  { %2089 = vmatpush3.bf16.msra.mxu1 %v2088_v42 }
0x1351   :  { %2091 = vmatprep.subr.bf16.mxu1 %v2090_v45 }
0x1354   :  { %2093 = vmatpush3.bf16.msra.mxu1 %v2092_v48 }
0x1355   :  { %2095 = vmatprep.subr.bf16.mxu1 %v2094_v54 }
0x1358   :  { %2097 = vmatpush3.bf16.msra.mxu1 %v2096_v56 }
0x140e   :  { %v1357_v28 = vpop.f32.mrb[12].mxu1  ;;  %v1428_v60 = vpop.f32.mrb[12].mxu0 }
0x140f   :  { %v1358_v5 = vadd.f32 %v1357_v28, %v1279_v52  ;;  %v1429_v6 = vadd.f32 %v1428_v60, %v1287_v2  ;;  %v1359_v7 = vpop.f32.mrb[13].mxu1  ;;  %v1949_v8 = vpop.f32.mrb[13].mxu0 }
0x1410   :  { %v1360_v62 = vadd.f32 %v1359_v7, %v1283_v3 }
0x1411   :  { %v1453_v14 = vsub.f32 %v1358_v5, %v1446_v10  ;;  %1432 = vst [vmem:[#allocation14] sm:$0x3] %v1429_v6 }
0x1412   :  { %v1454_v63 = vsub.f32 %v1360_v62, %v1450_v4 }
0x1413   :  { %v1468_v17 = vmul.f32 %v1461_v12, %v1453_v14 }
0x1414   :  { %v1469_v19 = vmul.f32 %v1465_v9, %v1454_v63 }
0x1415   :  { %v1481_v21 = vmul.f32 %v1474_v15, %v1468_v17 }
0x1416   :  { %v1482_v22 = vmul.f32 %v1478_v16, %v1469_v19 }
0x1417   :  { %v1494_v23 = vadd.f32 %v1487_v18, %v1481_v21 }
0x1418   :  { %v1495_v25 = vadd.f32 %v1491_v20, %v1482_v22 }
0x1419   :  { %v1496_v24 = vmax.f32 %v1494_v23, 0.0 }
0x141a   :  { %v1497_v26 = vmax.f32 %v1495_v25, 0.0 }
0x141c   :  { %1594 = vmatprep.mubr.f32.mxu1 %v1497_v26 }
0x141d   :  { %1595 = vmatmul.mubr.f32.vlgmr.msra.gmra.mrb[14].mxu1 %v1496_v24 }
0x141e   :  { %2255 = shalt.err (!%p2252_p2)
}
0x141f   :  { %s2256_s28 = scalar_lea.hbm %s2840_s10, 32 }
0x1420   :  { %p2257_p3 = scmp.ne.s32.totalorder %s2840_s10, %s2256_s28  ;;  %p2260_p4 = scmp.lt.u32.totalorder %s2256_s28, %s2840_s10 }
0x1422   :  { %p2262_p5 = pnand %p2260_p4, %p2257_p3 }
0x1424   :  { %2265 = shalt.err (!%p2262_p5)
}
0x1425   :  { %1610 = dma.vmem_to_hbm [thread:$0]  %s1608_s8, 32, %s2840_s10, [#allocation4]   ;;  %v1441_v41 = vld [vmem:[%s2839_s9 + $0x5] ss:$0 sm:$0xff] }
0x1426   :  { %s2336_s19 = smov [#allocation12]   ;;  %s2337_s5 = smov [#allocation14]  }
0x1427   :  { %s1617_s20 = sshll.u32 %s2336_s19, 4  ;;  %s1627_s30 = sshll.u32 %s2337_s5, 4  ;;  %s1618_s20 = int_to_ptr.vmem [resolvable:$true] %s1617_s20  ;;  %s1628_s30 = int_to_ptr.vmem [resolvable:$true] %s1627_s30 }
0x1428   :  { %s2266_s15 = scalar_lea.vmem %s1618_s20, 32  ;;  %p2271_p7 = scmp.lt.s32.totalorder %s1618_s20, %s1618_s20 }
0x1429   :  { %p2267_p6 = scmp.ne.s32.totalorder %s1618_s20, %s2266_s15  ;;  %p2272_p8 = scmp.lt.s32.totalorder %s2266_s15, %s2266_s15 }
0x142b   :  { %p2273_p9 = por %p2272_p8, %p2271_p7 }
0x142d   :  { %p2274_p10 = pnand %p2273_p9, %p2267_p6 }
0x14f0   :  { %v1788_v11 = vpop.f32.mrb[14].mxu1 }
0x14f1   :  { %v1789_v27 = vpop.f32.mrb[15].mxu1 }
0x14f2   :  { %v1790_v29 = vadd.f32 %v1789_v27, %v1788_v11 }
0x14f4   :  { %v1597_v1 = vadd.f32 %v1790_v29, %v1441_v41 }
0x14f6   :  { %1600 = vst [vmem:[#allocation12] sm:$0x3] %v1597_v1 }
0x14f7   :  { %2277 = shalt.err (!%p2274_p10)
}
0x14f8   :  { %s2278_s9 = scalar_lea.hbm %s2841_s11, 32 }
0x14f9   :  { %p2279_p11 = scmp.ne.s32.totalorder %s2841_s11, %s2278_s9  ;;  %p2282_p12 = scmp.lt.u32.totalorder %s2278_s9, %s2841_s11 }
0x14fb   :  { %p2284_p13 = pnand %p2282_p12, %p2279_p11 }
0x14fd   :  { %2287 = shalt.err (!%p2284_p13)
}
0x14fe   :  { %1620 = dma.vmem_to_hbm [thread:$0]  %s1618_s20, 32, %s2841_s11, [#allocation13]  }
0x14ff   :  { %s2288_s6 = scalar_lea.vmem %s1628_s30, 32  ;;  %p2293_p1 = scmp.lt.s32.totalorder %s1628_s30, %s1628_s30 }
0x1500   :  { %p2289_p0 = scmp.ne.s32.totalorder %s1628_s30, %s2288_s6  ;;  %p2294_p2 = scmp.lt.s32.totalorder %s2288_s6, %s2288_s6 }
0x1502   :  { %p2295_p3 = por %p2294_p2, %p2293_p1 }
0x1504   :  { %p2296_p4 = pnand %p2295_p3, %p2289_p0 }
0x1506   :  { %2299 = shalt.err (!%p2296_p4)
}
0x1507   :  { %s2300_s1 = scalar_lea.hbm %s2842_s12, 32 }
0x1508   :  { %p2301_p5 = scmp.ne.s32.totalorder %s2842_s12, %s2300_s1  ;;  %p2304_p6 = scmp.lt.u32.totalorder %s2300_s1, %s2842_s12 }
0x150a   :  { %p2306_p7 = pnand %p2304_p6, %p2301_p5 }
0x150c   :  { %2309 = shalt.err (!%p2306_p7)
}
0x150d   :  { %1630 = dma.vmem_to_hbm [thread:$0]  %s1628_s30, 32, %s2842_s12, [#allocation13]  }
0x150e   :  { %2316 = dma.done.wait [#allocation4], 32  }
0x150f   :  { %2317 = vsyncadd [#allocation4], 4294967264 }
0x1510   :  { %2318 = dma.done.wait [#allocation13], 64  }
0x1511   :  { %2319 = vsyncadd [#allocation13], 4294967232 }
0x1512   :  { %1640 = vsyncpa [#allocation3], 1 }
0x1513   :  { %1641 = vsyncpa [#allocation6], 1 }
0x1514   :  { %1642 = vsyncpa [#allocation9], 1 }
0x1515   :  { %1643 = vsyncpa [#allocation4], 1 }
0x1516   :  { %1644 = vsyncpa [#allocation13], 1 }

</bundles_post_ra>
